<compile_context>
chip_gen: v7x
topology: tpu7x:2x2x1
jax: 0.10.0
libtpu: 0.0.40
codegen_flags: <defaults>
</compile_context>

<pallas_src>
import functools

import jax
import jax.numpy as jnp
from jax.experimental import pallas as pl
from jax.experimental.pallas import tpu as pltpu


# ---------------------------------------------------------------------------
# Kernel: one fused "reference - score" evaluation for a tile of the batch.
# ---------------------------------------------------------------------------
def score_diff_kernel(t_ref, x_ref, w1_ref, a_ref, b1_ref, w2_ref, b2_ref,
                      o_ref):
    t = t_ref[...]                                           # (bb, 1)   f32
    x = x_ref[...]                                           # (bb, Dp)  mxu dtype

    # First matmul over the CONCATENATED hidden (both score nets at once).
    h = jnp.dot(x, w1_ref[...], preferred_element_type=jnp.float32)  # (bb, 2Hp)
    # Time conditioning + bias + relu in f32 on the VPU.
    h = jnp.maximum(h + t * a_ref[...] + b1_ref[...], 0.0)

    # Second matmul: W2cat = [W2_ref ; -W2_score], so this directly produces
    # score_ref - score (subtraction folded into the contraction).
    out = jnp.dot(h.astype(w2_ref.dtype), w2_ref[...],
                  preferred_element_type=jnp.float32)                # (bb, Dp)
    o_ref[...] = out + b2_ref[...]                                   # f32 store


# ---------------------------------------------------------------------------
# Parameter construction / fusion (plain JAX glue).
# ---------------------------------------------------------------------------
def make_score_params(key, d, h):
    """Deterministic synthetic parameters for one time-conditioned score MLP."""
    k1, k2, k3, k4, k5 = jax.random.split(key, 5)
    scale1 = 1.0 / jnp.sqrt(d)
    scale2 = 1.0 / jnp.sqrt(h)
    w1 = jax.random.normal(k1, (d, h), jnp.float32) * scale1
    a = jax.random.normal(k2, (1, h), jnp.float32) * scale1   # time-embedding row
    b1 = jax.random.normal(k3, (1, h), jnp.float32) * 0.1
    w2 = jax.random.normal(k4, (h, d), jnp.float32) * scale2
    b2 = jax.random.normal(k5, (1, d), jnp.float32) * 0.1
    return (w1, a, b1, w2, b2)


def _fuse_params(params_ref, params_score):
    """Concatenate the two score nets; fold the final subtraction into W2/b2."""
    w1r, ar, b1r, w2r, b2r = params_ref
    w1s, a_s, b1s, w2s, b2s = params_score
    w1c = jnp.concatenate([w1r, w1s], axis=1)        # (D, 2H)
    a_c = jnp.concatenate([ar, a_s], axis=1)         # (1, 2H)
    b1c = jnp.concatenate([b1r, b1s], axis=1)        # (1, 2H)
    w2c = jnp.concatenate([w2r, -w2s], axis=0)       # (2H, D)  minus folds the sub
    b2d = b2r - b2s                                  # (1, D)
    return w1c, a_c, b1c, w2c, b2d


def _round_up(n, m):
    return ((n + m - 1) // m) * m


def _pad2d(x, rows, cols):
    r, c = x.shape
    return jnp.pad(x, ((0, rows - r), (0, cols - c)))


# ---------------------------------------------------------------------------
# Wrapper: mirrors ScoreWithReferenceScore.forward.
# ---------------------------------------------------------------------------
@functools.partial(jax.jit, static_argnames=("mxu_dtype", "block_b"))
def _score_diff_pallas(t_col, x, params_ref, params_score, *,
                       mxu_dtype=jnp.bfloat16, block_b=256):
    b, d = x.shape
    w1c, a_c, b1c, w2c, b2d = _fuse_params(params_ref, params_score)
    h2 = w1c.shape[1]                                 # 2H (fused hidden)

    # Lane-dense / sublane-aligned padded sizes.
    dp = _round_up(d, 128)
    h2p = _round_up(h2, 128)
    bb = min(block_b, _round_up(b, 8))                # rows per grid step
    bp = _round_up(b, bb)

    x_p = _pad2d(x.astype(mxu_dtype), bp, dp)
    t_p = jnp.pad(t_col.astype(jnp.float32), ((0, bp - b), (0, 0)))
    w1_p = _pad2d(w1c.astype(mxu_dtype), dp, h2p)
    a_p = _pad2d(a_c, 1, h2p)                         # elementwise params stay f32
    b1_p = _pad2d(b1c, 1, h2p)
    w2_p = _pad2d(w2c.astype(mxu_dtype), h2p, dp)
    b2_p = _pad2d(b2d, 1, dp)

    itemsize = jnp.dtype(mxu_dtype).itemsize
    cost = pl.CostEstimate(
        flops=2 * bp * dp * h2p + 2 * bp * h2p * dp,
        transcendentals=0,
        bytes_accessed=(t_p.size * 4
                        + (x_p.size + w1_p.size + w2_p.size) * itemsize
                        + (a_p.size + b1_p.size + b2_p.size) * 4
                        + bp * dp * 4),
    )

    def batch_spec(shp):
        return pl.BlockSpec(shp, lambda i: (i, 0))

    def const_spec(shp):
        return pl.BlockSpec(shp, lambda i: (0, 0))   # same block every step -> no re-DMA

    out = pl.pallas_call(
        score_diff_kernel,
        out_shape=jax.ShapeDtypeStruct((bp, dp), jnp.float32),
        grid=(bp // bb,),
        in_specs=[
            batch_spec((bb, 1)),        # t column
            batch_spec((bb, dp)),       # x tile
            const_spec((dp, h2p)),      # fused W1
            const_spec((1, h2p)),       # fused time-embedding row
            const_spec((1, h2p)),       # fused b1
            const_spec((h2p, dp)),      # fused W2 (score half negated)
            const_spec((1, dp)),        # b2_ref - b2_score
        ],
        out_specs=batch_spec((bb, dp)),
        compiler_params=pltpu.CompilerParams(
            dimension_semantics=("parallel",)),
        cost_estimate=cost,
    )(t_p, x_p, w1_p, a_p, b1_p, w2_p, b2_p)

    return out[:b, :d]


def score_with_reference_score(t, x, params_ref, params_score,
                               *, mxu_dtype=jnp.bfloat16, block_b=256):
    """Mirrors ScoreWithReferenceScore.forward for t: float / (B,) / (B,1)."""
    b, _ = x.shape
    if isinstance(t, float):
        t_col = jnp.full((b, 1), t, jnp.float32)
    else:
        t = jnp.asarray(t)
        if t.ndim == 1:
            if t.shape[0] != b:
                raise ValueError(f"t has length {t.shape[0]} but batch is {b}")
            t_col = t.astype(jnp.float32).reshape(b, 1)
        elif t.ndim == 2 and t.shape == (b, 1):
            # For this per-row time-conditioned MLP, the vmapped score_ref
            # branch reduces to feeding each row its own scalar t.
            t_col = t.astype(jnp.float32)
        else:
            # TODO(synk): general vmapped score_ref branch (t with >=2 dims of
            # arbitrary trailing shape) not implemented.
            raise NotImplementedError("batched-t vmap branch not implemented")

    return _score_diff_pallas(t_col, x, tuple(params_ref), tuple(params_score),
                              mxu_dtype=mxu_dtype, block_b=block_b)


# ---------------------------------------------------------------------------
# Pure-JAX reference (unfused, f32) for correctness checks.
# ---------------------------------------------------------------------------
def _reference_jax(t, x, params_ref, params_score):
    b = x.shape[0]
    t_col = (jnp.full((b, 1), t, jnp.float32) if isinstance(t, float)
             else jnp.asarray(t, jnp.float32).reshape(b, 1))

    def mlp(p):
        w1, a, b1, w2, b2 = p
        h = jnp.maximum(x @ w1 + t_col * a + b1, 0.0)
        return h @ w2 + b2

    return mlp(params_ref) - mlp(params_score)


if __name__ == "__main__":
    # Lane-dense, batch-amortized shapes (per perf review): still tiny in bytes.
    B, D, H = 512, 128, 128

    key = jax.random.PRNGKey(0)
    k_x, k_t, k_pref, k_ps = jax.random.split(key, 4)

    x = jax.random.normal(k_x, (B, D), jnp.float32)
    t = jax.random.uniform(k_t, (B,), jnp.float32)       # 1-D t -> score_ref path

    params_ref = make_score_params(k_pref, D, H)
    params_score = make_score_params(k_ps, D, H)

    expected = _reference_jax(t, x, params_ref, params_score)

    # f32 MXU path: tight check of the fused-kernel math.
    out_f32 = jax.block_until_ready(
        score_with_reference_score(t, x, params_ref, params_score,
                                   mxu_dtype=jnp.float32))
    assert out_f32.shape == (B, D)
    assert jnp.allclose(out_f32, expected, atol=1e-3, rtol=1e-3)

    # bf16 MXU-input path (default; v6e/v7x feed dtype): loose sanity check,
    # difference vs the f32 reference is only bf16 input rounding.
    out_bf16 = jax.block_until_ready(
        score_with_reference_score(t, x, params_ref, params_score))
    assert out_bf16.shape == (B, D)
    assert jnp.allclose(out_bf16, expected, atol=1e-1, rtol=1e-1)

    print("KERNEL_OK")
</pallas_src>

<mosaic_0001>
module attributes {stable_mosaic.version = 11 : i64} {
  func.func @score_diff_kernel(%arg0: i32, %arg1: memref<256x1xf32, #tpu.memory_space<vmem>>, %arg2: memref<256x128xf32, #tpu.memory_space<vmem>>, %arg3: memref<128x256xf32, #tpu.memory_space<vmem>>, %arg4: memref<1x256xf32, #tpu.memory_space<vmem>>, %arg5: memref<1x256xf32, #tpu.memory_space<vmem>>, %arg6: memref<256x128xf32, #tpu.memory_space<vmem>>, %arg7: memref<1x128xf32, #tpu.memory_space<vmem>>, %arg8: memref<256x128xf32, #tpu.memory_space<vmem>>) attributes {dimension_semantics = [#tpu.dimension_semantics<parallel>], iteration_bounds = array<i64: 2>, scalar_prefetch = 0 : i64, scratch_operands = 0 : i64, tpu.core_type = #tpu.core_type<tc>, window_params = [{transform_indices = @transform_0, window_bounds = array<i64: 256, 1>}, {transform_indices = @transform_1, window_bounds = array<i64: 256, 128>}, {pipeline_mode = #tpu.pipeline_mode<synchronous>, transform_indices = @transform_2, window_bounds = array<i64: 128, 256>}, {pipeline_mode = #tpu.pipeline_mode<synchronous>, transform_indices = @transform_3, window_bounds = array<i64: 1, 256>}, {pipeline_mode = #tpu.pipeline_mode<synchronous>, transform_indices = @transform_4, window_bounds = array<i64: 1, 256>}, {pipeline_mode = #tpu.pipeline_mode<synchronous>, transform_indices = @transform_5, window_bounds = array<i64: 256, 128>}, {pipeline_mode = #tpu.pipeline_mode<synchronous>, transform_indices = @transform_6, window_bounds = array<i64: 1, 128>}, {transform_indices = @transform_7, window_bounds = array<i64: 256, 128>}]} {
    %c0 = arith.constant 0 : index
    %c0_0 = arith.constant 0 : index
    %0 = vector.load %arg1[%c0, %c0_0] : memref<256x1xf32, #tpu.memory_space<vmem>>, vector<256x1xf32>
    %c0_1 = arith.constant 0 : index
    %c0_2 = arith.constant 0 : index
    %1 = vector.load %arg2[%c0_1, %c0_2] : memref<256x128xf32, #tpu.memory_space<vmem>>, vector<256x128xf32>
    %c0_3 = arith.constant 0 : index
    %c0_4 = arith.constant 0 : index
    %2 = vector.load %arg3[%c0_3, %c0_4] : memref<128x256xf32, #tpu.memory_space<vmem>>, vector<128x256xf32>
    %cst = arith.constant dense<0.000000e+00> : vector<256x256xf32>
    %3 = tpu.matmul %1, %2, %cst {dimension_numbers = #tpu.dot_dimension_numbers<[1], [0], [0], [1], [0, 0, 1, 1], [], []>} : vector<256x128xf32>, vector<128x256xf32>, vector<256x256xf32> -> vector<256x256xf32>
    %c0_5 = arith.constant 0 : index
    %c0_6 = arith.constant 0 : index
    %4 = vector.load %arg4[%c0_5, %c0_6] : memref<1x256xf32, #tpu.memory_space<vmem>>, vector<1x256xf32>
    %5 = vector.broadcast %0 : vector<256x1xf32> to vector<256x256xf32>
    %6 = vector.broadcast %4 : vector<1x256xf32> to vector<256x256xf32>
    %7 = arith.mulf %5, %6 : vector<256x256xf32>
    %8 = arith.addf %3, %7 : vector<256x256xf32>
    %c0_7 = arith.constant 0 : index
    %c0_8 = arith.constant 0 : index
    %9 = vector.load %arg5[%c0_7, %c0_8] : memref<1x256xf32, #tpu.memory_space<vmem>>, vector<1x256xf32>
    %10 = vector.broadcast %9 : vector<1x256xf32> to vector<256x256xf32>
    %11 = arith.addf %8, %10 : vector<256x256xf32>
    %cst_9 = arith.constant 0.000000e+00 : f32
    %12 = vector.broadcast %cst_9 : f32 to vector<256x256xf32>
    %13 = arith.maximumf %11, %12 : vector<256x256xf32>
    %c0_10 = arith.constant 0 : index
    %c0_11 = arith.constant 0 : index
    %14 = vector.load %arg6[%c0_10, %c0_11] : memref<256x128xf32, #tpu.memory_space<vmem>>, vector<256x128xf32>
    %cst_12 = arith.constant dense<0.000000e+00> : vector<256x128xf32>
    %15 = tpu.matmul %13, %14, %cst_12 {dimension_numbers = #tpu.dot_dimension_numbers<[1], [0], [0], [1], [0, 0, 1, 1], [], []>} : vector<256x256xf32>, vector<256x128xf32>, vector<256x128xf32> -> vector<256x128xf32>
    %c0_13 = arith.constant 0 : index
    %c0_14 = arith.constant 0 : index
    %16 = vector.load %arg7[%c0_13, %c0_14] : memref<1x128xf32, #tpu.memory_space<vmem>>, vector<1x128xf32>
    %17 = vector.broadcast %16 : vector<1x128xf32> to vector<256x128xf32>
    %18 = arith.addf %15, %17 : vector<256x128xf32>
    %c0_15 = arith.constant 0 : index
    %c0_16 = arith.constant 0 : index
    %19 = vector.load %arg8[%c0_15, %c0_16] : memref<256x128xf32, #tpu.memory_space<vmem>>, vector<256x128xf32>
    tpu.vector_store %arg8[%c0_15, %c0_16], %18 {strides = array<i32>} : memref<256x128xf32, #tpu.memory_space<vmem>>, vector<256x128xf32>,
    return
  }
  func.func @transform_0(%arg0: i32) -> (i32, i32) {
    %c0_i32 = arith.constant 0 : i32
    %c0_i32_0 = arith.constant 0 : i32
    return %arg0, %c0_i32 : i32, i32
  }
  func.func @transform_1(%arg0: i32) -> (i32, i32) {
    %c0_i32 = arith.constant 0 : i32
    %c0_i32_0 = arith.constant 0 : i32
    return %arg0, %c0_i32 : i32, i32
  }
  func.func @transform_2(%arg0: i32) -> (i32, i32) {
    %c0_i32 = arith.constant 0 : i32
    %c0_i32_0 = arith.constant 0 : i32
    %c0_i32_1 = arith.constant 0 : i32
    return %c0_i32, %c0_i32_0 : i32, i32
  }
  func.func @transform_3(%arg0: i32) -> (i32, i32) {
    %c0_i32 = arith.constant 0 : i32
    %c0_i32_0 = arith.constant 0 : i32
    %c0_i32_1 = arith.constant 0 : i32
    return %c0_i32, %c0_i32_0 : i32, i32
  }
  func.func @transform_4(%arg0: i32) -> (i32, i32) {
    %c0_i32 = arith.constant 0 : i32
    %c0_i32_0 = arith.constant 0 : i32
    %c0_i32_1 = arith.constant 0 : i32
    return %c0_i32, %c0_i32_0 : i32, i32
  }
  func.func @transform_5(%arg0: i32) -> (i32, i32) {
    %c0_i32 = arith.constant 0 : i32
    %c0_i32_0 = arith.constant 0 : i32
    %c0_i32_1 = arith.constant 0 : i32
    return %c0_i32, %c0_i32_0 : i32, i32
  }
  func.func @transform_6(%arg0: i32) -> (i32, i32) {
    %c0_i32 = arith.constant 0 : i32
    %c0_i32_0 = arith.constant 0 : i32
    %c0_i32_1 = arith.constant 0 : i32
    return %c0_i32, %c0_i32_0 : i32, i32
  }
  func.func @transform_7(%arg0: i32) -> (i32, i32) {
    %c0_i32 = arith.constant 0 : i32
    %c0_i32_0 = arith.constant 0 : i32
    return %arg0, %c0_i32 : i32, i32
  }
}

</mosaic_0001>

<bundles_post_ra>
// kernel: sub.1
= control target key start
LH: loop header
LB: loop body
LE: loop exit
PB: predicated region body
PF: predicated region fallthrough
CT: control target
= control target key end

     0   :  { %s34_s0 = inlined_call_operand.vmem [shape: f32[1,128], index: 0, kind: input, shape index: {}]   ;;  %s35_s1 = inlined_call_operand.vmem [shape: f32[1,128], index: 1, kind: input, shape index: {}]   ;;  %s36_s2 = inlined_call_operand.vmem [shape: f32[1,128], index: 2, kind: output, shape index: {}]  }
   0x1   :  { %v3_v0 = vld [vmem:[%s34_s0] sm:$0x1] }
   0x2   :  { %v4_v1 = vld [vmem:[%s35_s1] sm:$0x1] }
   0x3   :  { %v7_v2 = vsub.f32 %v3_v0, %v4_v1 }
   0x5   :  { %9 = vst [vmem:[%s36_s2] sm:$0x1] %v7_v2 }

// kernel: neg.1
= control target key start
LH: loop header
LB: loop body
LE: loop exit
PB: predicated region body
PF: predicated region fallthrough
CT: control target
= control target key end

     0   :  { %2 = vsyncpa [#allocation1], 0  ;;  %s183_s6 = smov [#allocation0]   ;;  %s256_s0 = inlined_call_operand.hbm [shape: f32[128,128], index: 0, kind: input, shape index: {}]   ;;  %s257_s1 = inlined_call_operand.vmem [shape: f32[128,128], index: 1, kind: output, shape index: {}]  }
   0x1   :  { %s6_s7 = sshll.u32 %s183_s6, 4  ;;  %s159_s10 = scalar_lea.hbm %s256_s0, 2048  ;;  %s7_s7 = int_to_ptr.vmem [resolvable:$true] %s6_s7 }
   0x2   :  { %p160_p0 = scmp.ne.s32.totalorder %s256_s0, %s159_s10  ;;  %p163_p1 = scmp.lt.u32.totalorder %s159_s10, %s256_s0 }
   0x4   :  { %p165_p2 = pnand %p163_p1, %p160_p0 }
   0x6   :  { %168 = shalt.err (!%p165_p2)
}
   0x7   :  { %s169_s15 = scalar_lea.vmem %s7_s7, 2048  ;;  %p174_p4 = scmp.lt.s32.totalorder %s7_s7, %s7_s7 }
   0x8   :  { %p170_p3 = scmp.ne.s32.totalorder %s7_s7, %s169_s15  ;;  %p175_p5 = scmp.lt.s32.totalorder %s169_s15, %s169_s15 }
   0xa   :  { %p176_p6 = por %p175_p5, %p174_p4 }
   0xc   :  { %p177_p7 = pnand %p176_p6, %p170_p3 }
   0xe   :  { %180 = shalt.err (!%p177_p7)
}
   0xf   :  { %s184_s16 = smov 128   ;;  %s185_s17 = smov 8  }
  0x10   :  { %12 = dma.hbm_to_vmem [thread:$0]  %s256_s0, 2048, %s7_s7, [#allocation1], %s184_s16, %s184_s16, %s185_s17  }
  0x11   :  { %181 = dma.done.wait [#allocation1], 2048  }
  0x12   :  { %182 = vsyncadd [#allocation1], 4294965248  ;;  %v14_v0 = vld [vmem:[#allocation0] sm:$0xff]  ;;  %v21_v1 = vld [vmem:[#allocation0 + $0x8] sm:$0xff] }
  0x13   :  { %v29_v2 = vld [vmem:[#allocation0 + $0x10] sm:$0xff]  ;;  %v17_v3 = vxor.u32 2147483648, %v14_v0  ;;  %v24_v4 = vxor.u32 2147483648, %v21_v1  ;;  %v37_v6 = vld [vmem:[#allocation0 + $0x18] sm:$0xff]  ;;  %v45_v7 = vld [vmem:[#allocation0 + $0x20] sm:$0xff] }
  0x14   :  { %v32_v5 = vxor.u32 2147483648, %v29_v2  ;;  %v53_v8 = vld [vmem:[#allocation0 + $0x28] sm:$0xff]  ;;  %v40_v9 = vxor.u32 2147483648, %v37_v6  ;;  %v48_v10 = vxor.u32 2147483648, %v45_v7  ;;  %v61_v12 = vld [vmem:[#allocation0 + $0x30] sm:$0xff]  ;;  %v69_v13 = vld [vmem:[#allocation0 + $0x38] sm:$0xff] }
  0x15   :  { %v56_v11 = vxor.u32 2147483648, %v53_v8  ;;  %v77_v14 = vld [vmem:[#allocation0 + $0x40] sm:$0xff]  ;;  %19 = vst [vmem:[%s257_s1] sm:$0xff] %v17_v3  ;;  %141 = vst [vmem:[%s257_s1 + $0x8] sm:$0xff] %v24_v4  ;;  %v64_v15 = vxor.u32 2147483648, %v61_v12  ;;  %v72_v16 = vxor.u32 2147483648, %v69_v13  ;;  %v85_v18 = vld [vmem:[#allocation0 + $0x48] sm:$0xff] }
  0x16   :  { %142 = vst [vmem:[%s257_s1 + $0x10] sm:$0xff] %v32_v5  ;;  %v80_v17 = vxor.u32 2147483648, %v77_v14  ;;  %v93_v19 = vld [vmem:[#allocation0 + $0x50] sm:$0xff]  ;;  %v101_v20 = vld [vmem:[#allocation0 + $0x58] sm:$0xff]  ;;  %143 = vst [vmem:[%s257_s1 + $0x18] sm:$0xff] %v40_v9  ;;  %v88_v21 = vxor.u32 2147483648, %v85_v18 }
  0x17   :  { %144 = vst [vmem:[%s257_s1 + $0x20] sm:$0xff] %v48_v10  ;;  %145 = vst [vmem:[%s257_s1 + $0x28] sm:$0xff] %v56_v11  ;;  %v96_v22 = vxor.u32 2147483648, %v93_v19  ;;  %v104_v23 = vxor.u32 2147483648, %v101_v20  ;;  %v109_v24 = vld [vmem:[#allocation0 + $0x60] sm:$0xff]  ;;  %v117_v25 = vld [vmem:[#allocation0 + $0x68] sm:$0xff] }
  0x18   :  { %v125_v26 = vld [vmem:[#allocation0 + $0x70] sm:$0xff]  ;;  %146 = vst [vmem:[%s257_s1 + $0x30] sm:$0xff] %v64_v15  ;;  %147 = vst [vmem:[%s257_s1 + $0x38] sm:$0xff] %v72_v16  ;;  %v112_v27 = vxor.u32 2147483648, %v109_v24  ;;  %v120_v28 = vxor.u32 2147483648, %v117_v25  ;;  %v133_v30 = vld [vmem:[#allocation0 + $0x78] sm:$0xff] }
  0x19   :  { %148 = vst [vmem:[%s257_s1 + $0x40] sm:$0xff] %v80_v17  ;;  %v128_v29 = vxor.u32 2147483648, %v125_v26  ;;  %149 = vst [vmem:[%s257_s1 + $0x48] sm:$0xff] %v88_v21  ;;  %v136_v31 = vxor.u32 2147483648, %v133_v30 }
  0x1a   :  { %150 = vst [vmem:[%s257_s1 + $0x50] sm:$0xff] %v96_v22  ;;  %151 = vst [vmem:[%s257_s1 + $0x58] sm:$0xff] %v104_v23 }
  0x1b   :  { %152 = vst [vmem:[%s257_s1 + $0x60] sm:$0xff] %v112_v27  ;;  %153 = vst [vmem:[%s257_s1 + $0x68] sm:$0xff] %v120_v28 }
  0x1c   :  { %154 = vst [vmem:[%s257_s1 + $0x70] sm:$0xff] %v128_v29  ;;  %155 = vst [vmem:[%s257_s1 + $0x78] sm:$0xff] %v136_v31 }
  0x1d   :  { %140 = vsyncpa [#allocation1], 1 }

// kernel: _score_diff_pallas.1
= control target key start
LH: loop header
LB: loop body
LE: loop exit
PB: predicated region body
PF: predicated region fallthrough
CT: control target
= control target key end

     0   :  { %12 = vsyncpa [#allocation3], 0  ;;  %s2419_s0 = inlined_call_operand.vmem [shape: f32[512,1], index: 0, kind: input, shape index: {}]   ;;  %s2420_s1 = inlined_call_operand.vmem [shape: f32[512,128], index: 1, kind: input, shape index: {}]   ;;  %s2421_s2 = inlined_call_operand.vmem [shape: f32[128,256], index: 2, kind: input, shape index: {}]   ;;  %s2422_s3 = inlined_call_operand.vmem [shape: f32[1,256], index: 3, kind: input, shape index: {}]   ;;  %s2423_s4 = inlined_call_operand.vmem [shape: f32[1,256], index: 4, kind: input, shape index: {}]   ;;  %s2424_s5 = inlined_call_operand.vmem [shape: f32[256,128], index: 5, kind: input, shape index: {}]   ;;  %s2425_s6 = inlined_call_operand.vmem [shape: f32[1,128], index: 6, kind: input, shape index: {}]   ;;  %s2426_s7 = inlined_call_operand.hbm [shape: f32[512,128], index: 7, kind: output, shape index: {}]  }
   0x1   :  { %14 = vsyncpa [#allocation3 + $0x1], 0  ;;  %s1699_s24 = smov 0   ;;  %s1701_s25 = smov 0  }
   0x2   :  { %s1703_s26 = smov 0   ;;  %s1705_s27 = smov 0  }
   0x3 LB: > { %s1720_s28 = sadd.s32 4294967295, %s1651_s27   ;;  %s1415_s29 = sadd.s32 4294967294, %s1651_s27   ;;  %s1651_s27 = sphi %s1705_s27, %s2433_s27   ;;  %s1647_s26 = sphi %s1703_s26, %s2432_s26   ;;  %s1643_s25 = sphi %s1701_s25, %s2431_s25   ;;  %s1639_s24 = sphi %s1699_s24, %s2430_s24  }
   0x4   : > { %s1724_s30 = sadd.s32 1, %s1651_s27   ;;  %s184_s8 = sadd.s32 1, %s1647_s26 }
   0x5   : > { %s181_s9 = ssub.s32 %s1651_s27, %s1724_s30  ;;  %p194_p0 = scmp.ne.s32.totalorder %s1647_s26, %s1643_s25 }
   0x6   : > { %p182_p1 = scmp.eq.s32.totalorder %s181_s9, 0  ;;  %p195_p2 = scmp.eq.s32.totalorder %s1720_s28, 1 }
   0x7   : > { %p200_p3 = scmp.ne.s32.totalorder %s1643_s25, %s1639_s24  ;;  %p201_p4 = scmp.eq.s32.totalorder %s1415_s29, 1 }
   0x8   : > { %s1735_s10 = scalar_select %p182_p1, %s1647_s26, %s184_s8  }
   0x9   : > { %p1737_p5 = por %p195_p2, %p194_p0  ;;  %p1741_p6 = por %p201_p4, %p200_p3 }
   0xa   : > { %p1418_p7 = scmp.ge.s32.totalorder %s1651_s27, 1  ;;  %p252_p8 = scmp.lt.s32.totalorder %s1651_s27, 3 }
   0xc   : > { %p253_p9 = pnand %p1418_p7, %p252_p8 }
   0xd   : > { %v367_v0 = vld [vmem:[%s2421_s2 + $0x8] sm:$0xff] (!%p253_p9)  ;;  %v369_v1 = vld [vmem:[%s2421_s2 + $0x18] sm:$0xff] (!%p253_p9)  ;;  %v366_v2 = vld [vmem:[%s2421_s2] sm:$0xff] (!%p253_p9)  ;;  %s1420_s19 = sshll.u32 (!%p253_p9), %s1720_s28, 5  ;;  %v1653_v7 = vmov (!%p253_p9), 0.0   ;;  %v1654_v8 = vmov (!%p253_p9), 0  }
   0xe   : > { %256 = sbr.rel (%p253_p9) target bundleno = 621 (0x26d), region = 48  ;;  %v1431_v3 = vpack.c.bf16 (!%p253_p9), %v369_v1, %v367_v0  ;;  %v368_v4 = vld [vmem:[%s2421_s2 + $0x10] sm:$0xff] (!%p253_p9)  ;;  %v371_v5 = vld [vmem:[%s2421_s2 + $0x28] sm:$0xff] (!%p253_p9)  ;;  %v373_v6 = vld [vmem:[%s2421_s2 + $0x38] sm:$0xff] (!%p253_p9)  ;;  %698 = vmatprep.mubr.f32.mxu0 (!%p253_p9), %v1653_v7  ;;  %p1767_p10 = scmp.lt.s32.totalorder (!%p253_p9), %s1420_s19, 63  ;;  %1587 = vset.pattern.permute.xlu0 (!%p253_p9), %v1654_v8  ;;  %v1655_v0 = vmov (!%p253_p9), 0.0|0.0  }
   0xf   : > { %v1433_v9 = vpack.c.bf16 (!%p253_p9), %v368_v4, %v366_v2  ;;  %v1435_v10 = vpack.c.bf16 (!%p253_p9), %v373_v6, %v371_v5  ;;  %v370_v11 = vld [vmem:[%s2421_s2 + $0x20] sm:$0xff] (!%p253_p9)  ;;  %v372_v12 = vld [vmem:[%s2421_s2 + $0x30] sm:$0xff] (!%p253_p9)  ;;  %v375_v13 = vld [vmem:[%s2421_s2 + $0x48] sm:$0xff] (!%p253_p9)  ;;  %1588 = vset.pattern.permute.xlu1 (!%p253_p9), %v1654_v8  ;;  %1511 = vmatprep.subr.bf16.mxu1 (!%p253_p9), %v1655_v0  ;;  %s286_s17 = sand.u32 (!%p253_p9), 1, %s1643_s25   ;;  %s1430_s23 = sshll.u32 (!%p253_p9), %s1720_s28, 12 }
  0x10   : > { %1432 = vmatprep.subr.bf16.mxu0 (!%p253_p9), %v1431_v3  ;;  %v377_v14 = vld [vmem:[%s2421_s2 + $0x58] sm:$0xff] (!%p253_p9)  ;;  %v1437_v15 = vpack.c.bf16 (!%p253_p9), %v372_v12, %v370_v11  ;;  %v374_v17 = vld [vmem:[%s2421_s2 + $0x40] sm:$0xff] (!%p253_p9)  ;;  %v376_v18 = vld [vmem:[%s2421_s2 + $0x50] sm:$0xff] (!%p253_p9)  ;;  %s1419_s18 = sshll.u32 (!%p253_p9), %s286_s17, 8  ;;  %s2378_s16 = scalar_lea.sflag (!%p253_p9), [#allocation3], %s286_s17 }
  0x11   : > { %1434 = vmatpush1.bf16.msra.mxu0 (!%p253_p9), %v1433_v9  ;;  %v1439_v16 = vpack.c.bf16 (!%p253_p9), %v377_v14, %v375_v13  ;;  %v379_v19 = vld [vmem:[%s2421_s2 + $0x68] sm:$0xff] (!%p253_p9)  ;;  %v381_v20 = vld [vmem:[%s2421_s2 + $0x78] sm:$0xff] (!%p253_p9)  ;;  %v1441_v21 = vpack.c.bf16 (!%p253_p9), %v376_v18, %v374_v17  ;;  %v378_v23 = vld [vmem:[%s2421_s2 + $0x60] sm:$0xff] (!%p253_p9)  ;;  %s2302_s22 = scalar_lea.vmem (!%p253_p9), [#allocation2], %s1419_s18 }
  0x12   : > { %1436 = vmatprep.subr.bf16.mxu0 (!%p253_p9), %v1435_v10  ;;  %v1443_v22 = vpack.c.bf16 (!%p253_p9), %v381_v20, %v379_v19  ;;  %v380_v24 = vld [vmem:[%s2421_s2 + $0x70] sm:$0xff] (!%p253_p9)  ;;  %v383_v25 = vld [vmem:[%s2421_s2 + $0x88] sm:$0xff] (!%p253_p9)  ;;  %v385_v26 = vld [vmem:[%s2421_s2 + $0x98] sm:$0xff] (!%p253_p9)  ;;  %s1341_s29 = sshll.u32 (!%p253_p9), %s2302_s22, 4  ;;  %s2372_s29 = int_to_ptr.vmem [resolvable:$true] %s1341_s29 }
  0x13   : > { %v1445_v27 = vpack.c.bf16 (!%p253_p9), %v380_v24, %v378_v23  ;;  %v1447_v28 = vpack.c.bf16 (!%p253_p9), %v385_v26, %v383_v25  ;;  %v382_v29 = vld [vmem:[%s2421_s2 + $0x80] sm:$0xff] (!%p253_p9)  ;;  %v384_v30 = vld [vmem:[%s2421_s2 + $0x90] sm:$0xff] (!%p253_p9)  ;;  %v387_v32 = vld [vmem:[%s2421_s2 + $0xa8] sm:$0xff] (!%p253_p9)  ;;  %s1589_s28 = scalar_lea.vmem (!%p253_p9), %s2372_s29, 4096 }
  0x14   : > { %v389_v33 = vld [vmem:[%s2421_s2 + $0xb8] sm:$0xff] (!%p253_p9)  ;;  %v1449_v35 = vpack.c.bf16 (!%p253_p9), %v384_v30, %v382_v29  ;;  %v386_v38 = vld [vmem:[%s2421_s2 + $0xa0] sm:$0xff] (!%p253_p9)  ;;  %v388_v39 = vld [vmem:[%s2421_s2 + $0xb0] sm:$0xff] (!%p253_p9)  ;;  %p1590_p11 = scmp.ne.s32.totalorder (!%p253_p9), %s2372_s29, %s1589_s28 }
  0x15   : > { %s2435_s19 = smov (!%p1767_p10, %s1420_s19), 63  ;;  %1438 = vmatpush1.bf16.msra.mxu0 %v1437_v15  ;;  %v1451_v37 = vpack.c.bf16 %v389_v33, %v387_v32  ;;  %v391_v40 = vld [vmem:[%s2421_s2 + $0xc8] sm:$0xff]  ;;  %v393_v41 = vld [vmem:[%s2421_s2 + $0xd8] sm:$0xff]  ;;  %v1453_v44 = vpack.c.bf16 %v388_v39, %v386_v38  ;;  %v390_v46 = vld [vmem:[%s2421_s2 + $0xc0] sm:$0xff] }
  0x16   : > { %1440 = vmatprep.subr.bf16.mxu0 %v1439_v16  ;;  %s1421_s21 = sshll.u32 %s2435_s19, 3  ;;  %v1455_v45 = vpack.c.bf16 %v393_v41, %v391_v40  ;;  %v392_v47 = vld [vmem:[%s2421_s2 + $0xd0] sm:$0xff]  ;;  %v395_v48 = vld [vmem:[%s2421_s2 + $0xe8] sm:$0xff]  ;;  %v397_v49 = vld [vmem:[%s2421_s2 + $0xf8] sm:$0xff]  ;;  %s2370_s19 = scalar_lea.hbm %s2426_s7, %s1430_s23 }
  0x17   : > { %s1817_s15 = scalar_lea.vmem %s2419_s0, %s1421_s21  ;;  %v1457_v52 = vpack.c.bf16 %v392_v47, %v390_v46  ;;  %v1459_v53 = vpack.c.bf16 %v397_v49, %v395_v48  ;;  %v394_v54 = vld [vmem:[%s2421_s2 + $0xe0] sm:$0xff]  ;;  %v396_v55 = vld [vmem:[%s2421_s2 + $0xf0] sm:$0xff]  ;;  %s1875_s8 = scalar_lea.vmem %s2420_s1, %s1421_s21  ;;  %v1032_v63 = vld [vmem:[%s2424_s5 + $0x8] sm:$0xff] }
  0x18   : > { %v306_v31 = vld [vmem:[%s1817_s15 + $0x20] sm:$0xff]  ;;  %v307_v34 = vld [vmem:[%s1817_s15 + $0x28] sm:$0xff]  ;;  %v308_v36 = vld [vmem:[%s1817_s15 + $0x30] sm:$0xff]  ;;  %v1461_v58 = vpack.c.bf16 %v396_v55, %v394_v54  ;;  %p1591_p12 = pnand %p1590_p11, %p1737_p5 }
  0x19   : > { %1442 = vmatpush1.bf16.msra.mxu0 %v1441_v21  ;;  %421 = vperm.xlu0 %1587, %v306_v31   ;;  %v309_v42 = vld [vmem:[%s1817_s15 + $0x38] sm:$0xff]  ;;  %v310_v43 = vld [vmem:[%s1817_s15 + $0x40] sm:$0xff]  ;;  %v311_v50 = vld [vmem:[%s1817_s15 + $0x48] sm:$0xff] }
  0x1a   : > { %1444 = vmatprep.subr.bf16.mxu0 %v1443_v22  ;;  %431 = vperm.xlu1 %1588, %v308_v36   ;;  %v312_v51 = vld [vmem:[%s1817_s15 + $0x50] sm:$0xff]  ;;  %v313_v56 = vld [vmem:[%s1817_s15 + $0x58] sm:$0xff]  ;;  %v314_v57 = vld [vmem:[%s1817_s15 + $0x60] sm:$0xff]  ;;  %p1592_p13 = pneg %p1591_p12 }
  0x1b   : > { %v315_v59 = vld [vmem:[%s1817_s15 + $0x68] sm:$0xff]  ;;  %v316_v60 = vld [vmem:[%s1817_s15 + $0x70] sm:$0xff]  ;;  %v334_v61 = vld [vmem:[%s1875_s8] sm:$0xff] }
  0x1c   : > { %v1031_v62 = vld [vmem:[%s2424_s5] sm:$0xff]  ;;  %v1033_v2 = vld [vmem:[%s2424_s5 + $0x10] sm:$0xff]  ;;  %v1034_v3 = vld [vmem:[%s2424_s5 + $0x18] sm:$0xff] }
  0x1d   : > { %1446 = vmatpush1.bf16.msra.mxu0 %v1445_v27  ;;  %426 = vperm.xlu0 %1587, %v307_v34   ;;  %v1464_v1 = vpack.c.bf16 %v1032_v63, %v1031_v62  ;;  %v317_v4 = vld [vmem:[%s1817_s15 + $0x78] sm:$0xff]  ;;  %v318_v5 = vld [vmem:[%s1817_s15 + $0x80] sm:$0xff]  ;;  %v335_v6 = vld [vmem:[%s1875_s8 + $0x8] sm:$0xff]  ;;  %v1467_v8 = vpack.c.bf16 %v1034_v3, %v1033_v2 }
  0x1e   : > { %1448 = vmatprep.subr.bf16.mxu0 %v1447_v28  ;;  %436 = vperm.xlu1 %1588, %v309_v42   ;;  %v1035_v9 = vld [vmem:[%s2424_s5 + $0x20] sm:$0xff]  ;;  %v1036_v10 = vld [vmem:[%s2424_s5 + $0x28] sm:$0xff]  ;;  %v320_v12 = vld [vmem:[%s1817_s15 + $0x90] sm:$0xff] }
  0x1f   : > { %1527 = vmatpush1.bf16.msra.mxu1 %v1464_v1  ;;  %v319_v11 = vld [vmem:[%s1817_s15 + $0x88] sm:$0xff]  ;;  %v336_v13 = vld [vmem:[%s1875_s8 + $0x10] sm:$0xff]  ;;  %v1470_v14 = vpack.c.bf16 %v1036_v10, %v1035_v9  ;;  %v1038_v16 = vld [vmem:[%s2424_s5 + $0x38] sm:$0xff] }
  0x20   : > { %1512 = vmatprep.subr.bf16.mxu1 %v1655_v0  ;;  %v1037_v15 = vld [vmem:[%s2424_s5 + $0x30] sm:$0xff]  ;;  %v321_v17 = vld [vmem:[%s1817_s15 + $0x98] sm:$0xff]  ;;  %v322_v18 = vld [vmem:[%s1817_s15 + $0xa0] sm:$0xff] }
  0x21   : > { %1450 = vmatpush1.bf16.msra.mxu0 %v1449_v35  ;;  %441 = vperm.xlu0 %1587, %v310_v43   ;;  %v337_v19 = vld [vmem:[%s1875_s8 + $0x18] sm:$0xff]  ;;  %v1473_v20 = vpack.c.bf16 %v1038_v16, %v1037_v15  ;;  %v1039_v21 = vld [vmem:[%s2424_s5 + $0x40] sm:$0xff]  ;;  %v1040_v22 = vld [vmem:[%s2424_s5 + $0x48] sm:$0xff] }
  0x22   : > { %1452 = vmatprep.subr.bf16.mxu0 %v1451_v37  ;;  %446 = vperm.xlu1 %1588, %v311_v50   ;;  %v323_v23 = vld [vmem:[%s1817_s15 + $0xa8] sm:$0xff]  ;;  %v324_v24 = vld [vmem:[%s1817_s15 + $0xb0] sm:$0xff]  ;;  %v338_v25 = vld [vmem:[%s1875_s8 + $0x20] sm:$0xff]  ;;  %v1476_v26 = vpack.c.bf16 %v1040_v22, %v1039_v21 }
  0x23   : > { %1528 = vmatpush1.bf16.msra.mxu1 %v1467_v8  ;;  %v1041_v27 = vld [vmem:[%s2424_s5 + $0x50] sm:$0xff]  ;;  %v1042_v28 = vld [vmem:[%s2424_s5 + $0x58] sm:$0xff]  ;;  %v326_v30 = vld [vmem:[%s1817_s15 + $0xc0] sm:$0xff] }
  0x24   : > { %1513 = vmatprep.subr.bf16.mxu1 %v1655_v0  ;;  %v325_v29 = vld [vmem:[%s1817_s15 + $0xb8] sm:$0xff]  ;;  %v339_v31 = vld [vmem:[%s1875_s8 + $0x28] sm:$0xff]  ;;  %v1479_v32 = vpack.c.bf16 %v1042_v28, %v1041_v27  ;;  %v1043_v33 = vld [vmem:[%s2424_s5 + $0x60] sm:$0xff] }
  0x25   : > { %1454 = vmatpush1.bf16.msra.mxu0 %v1453_v44  ;;  %451 = vperm.xlu0 %1587, %v312_v51   ;;  %v1044_v34 = vld [vmem:[%s2424_s5 + $0x68] sm:$0xff]  ;;  %v328_v36 = vld [vmem:[%s1817_s15 + $0xd0] sm:$0xff]  ;;  %v1046_v40 = vld [vmem:[%s2424_s5 + $0x78] sm:$0xff] }
  0x26   : > { %1456 = vmatprep.subr.bf16.mxu0 %v1455_v45  ;;  %456 = vperm.xlu1 %1588, %v313_v56   ;;  %v327_v35 = vld [vmem:[%s1817_s15 + $0xc8] sm:$0xff]  ;;  %v340_v37 = vld [vmem:[%s1875_s8 + $0x30] sm:$0xff]  ;;  %v1482_v38 = vpack.c.bf16 %v1044_v34, %v1043_v33  ;;  %v329_v41 = vld [vmem:[%s1817_s15 + $0xd8] sm:$0xff] }
  0x27   : > { %1529 = vmatpush1.bf16.msra.mxu1 %v1470_v14  ;;  %v1045_v39 = vld [vmem:[%s2424_s5 + $0x70] sm:$0xff]  ;;  %v302_v42 = vld [vmem:[%s1817_s15] sm:$0xff]  ;;  %v341_v43 = vld [vmem:[%s1875_s8 + $0x38] sm:$0xff] }
  0x28   : > { %1514 = vmatprep.subr.bf16.mxu1 %v1655_v0  ;;  %v1485_v44 = vpack.c.bf16 %v1046_v40, %v1045_v39  ;;  %v1047_v45 = vld [vmem:[%s2424_s5 + $0x80] sm:$0xff]  ;;  %v1048_v46 = vld [vmem:[%s2424_s5 + $0x88] sm:$0xff]  ;;  %v1049_v51 = vld [vmem:[%s2424_s5 + $0x90] sm:$0xff]  ;;  %v560_v39 = vlaneseq }
  0x29   : > { %1458 = vmatpush1.bf16.msra.mxu0 %v1457_v52  ;;  %461 = vperm.xlu0 %1587, %v314_v57   ;;  %v330_v47 = vld [vmem:[%s1817_s15 + $0xe0] sm:$0xff]  ;;  %v303_v48 = vld [vmem:[%s1817_s15 + $0x8] sm:$0xff]  ;;  %v1488_v50 = vpack.c.bf16 %v1048_v46, %v1047_v45  ;;  %v1050_v52 = vld [vmem:[%s2424_s5 + $0x98] sm:$0xff] }
  0x2a   : > { %1460 = vmatprep.subr.bf16.mxu0 %v1459_v53  ;;  %466 = vperm.xlu1 %1588, %v315_v59   ;;  %v342_v49 = vld [vmem:[%s1875_s8 + $0x40] sm:$0xff]  ;;  %v331_v53 = vld [vmem:[%s1817_s15 + $0xe8] sm:$0xff]  ;;  %v304_v54 = vld [vmem:[%s1817_s15 + $0x10] sm:$0xff]  ;;  %v1491_v56 = vpack.c.bf16 %v1050_v52, %v1049_v51 }
  0x2b   : > { %1530 = vmatpush1.bf16.msra.mxu1 %v1473_v20  ;;  %v343_v55 = vld [vmem:[%s1875_s8 + $0x48] sm:$0xff]  ;;  %v1051_v57 = vld [vmem:[%s2424_s5 + $0xa0] sm:$0xff]  ;;  %v332_v59 = vld [vmem:[%s1817_s15 + $0xf0] sm:$0xff] }
  0x2c   : > { %1515 = vmatprep.subr.bf16.mxu1 %v1655_v0  ;;  %v1053_v63 = vld [vmem:[%s2424_s5 + $0xb0] sm:$0xff]  ;;  %v333_v2 = vld [vmem:[%s1817_s15 + $0xf8] sm:$0xff]  ;;  %v350_v16 = vld [vmem:[%s1875_s8 + $0x80] sm:$0xff] }
  0x2d   : > { %1462 = vmatpush1.bf16.msra.mxu0 %v1461_v58  ;;  %471 = vperm.xlu0 %1587, %v316_v60   ;;  %v1052_v58 = vld [vmem:[%s2424_s5 + $0xa8] sm:$0xff]  ;;  %v305_v60 = vld [vmem:[%s1817_s15 + $0x18] sm:$0xff]  ;;  %v1057_v10 = vld [vmem:[%s2424_s5 + $0xd0] sm:$0xff]  ;;  %s1656_s15 = smov [#allocation2]  }
  0x2e   : > { %1463 = vmatprep.subr.bf16.mxu0 %v1655_v0  ;;  %476 = vperm.xlu1 %1588, %v317_v4   ;;  %v1494_v62 = vpack.c.bf16 %v1052_v58, %v1051_v57  ;;  %v345_v3 = vld [vmem:[%s1875_s8 + $0x58] sm:$0xff]  ;;  %v355_v21 = vld [vmem:[%s1875_s8 + $0xa8] sm:$0xff]  ;;  %v1059_v22 = vld [vmem:[%s2424_s5 + $0xe0] sm:$0xff] }
  0x2f   : > { %1531 = vmatpush1.bf16.msra.mxu1 %v1476_v26  ;;  %v349_v15 = vld [vmem:[%s1875_s8 + $0x78] sm:$0xff]  ;;  %v362_v34 = vld [vmem:[%s1875_s8 + $0xe0] sm:$0xff] }
  0x30   : > { %699 = vmatmul.mubr.f32.vlgmr.msra.gmra.mrb[0].mxu0 %v334_v61  ;;  %1516 = vmatprep.subr.bf16.mxu1 %v1655_v0  ;;  %v344_v61 = vld [vmem:[%s1875_s8 + $0x50] sm:$0xff]  ;;  %v1062_v27 = vld [vmem:[%s2424_s5 + $0xf8] sm:$0xff]  ;;  %v398_v46 = vld [vmem:[%s2422_s3] sm:$0x3] }
  0x31   : > { %704 = vmatprep.mubr.f32.mxu0 %v1653_v7  ;;  %1465 = vmatpush1.bf16.msra.mxu0 %v1464_v1  ;;  %v1054_v1 = vld [vmem:[%s2424_s5 + $0xb8] sm:$0xff] }
  0x32   : > { %1466 = vmatprep.subr.bf16.mxu0 %v1655_v0  ;;  %481 = vperm.xlu0 %1587, %v318_v5   ;;  %v1497_v4 = vpack.c.bf16 %v1054_v1, %v1053_v63  ;;  %v1055_v5 = vld [vmem:[%s2424_s5 + $0xc0] sm:$0xff] }
  0x33   : > { %486 = vperm.xlu1 %1588, %v319_v11   ;;  %1532 = vmatpush1.bf16.msra.mxu1 %v1479_v32  ;;  %v1058_v11 = vld [vmem:[%s2424_s5 + $0xd8] sm:$0xff] }
  0x34   : > { %705 = vmatmul.mubr.f32.gmra.mrb[2].mxu0 %v335_v6  ;;  %1517 = vmatprep.subr.bf16.mxu1 %v1655_v0  ;;  %v1056_v6 = vld [vmem:[%s2424_s5 + $0xc8] sm:$0xff] }
  0x35   : > { %710 = vmatprep.mubr.f32.mxu0 %v1653_v7  ;;  %1468 = vmatpush1.bf16.msra.mxu0 %v1467_v8  ;;  %v346_v8 = vld [vmem:[%s1875_s8 + $0x60] sm:$0xff]  ;;  %v1500_v9 = vpack.c.bf16 %v1056_v6, %v1055_v5 }
  0x36   : > { %1469 = vmatprep.subr.bf16.mxu0 %v1655_v0  ;;  %491 = vperm.xlu0 %1587, %v320_v12   ;;  %v347_v12 = vld [vmem:[%s1875_s8 + $0x68] sm:$0xff]  ;;  %v891_v6 = vld [vmem:[%s2423_s4] sm:$0x3] }
  0x37   : > { %496 = vperm.xlu1 %1588, %v321_v17   ;;  %1533 = vmatpush1.bf16.msra.mxu1 %v1482_v38  ;;  %v351_v17 = vld [vmem:[%s1875_s8 + $0x88] sm:$0xff] }
  0x38   : > { %711 = vmatmul.mubr.f32.gmra.mrb[4].mxu0 %v336_v13  ;;  %1518 = vmatprep.subr.bf16.mxu1 %v1655_v0  ;;  %v1503_v13 = vpack.c.bf16 %v1058_v11, %v1057_v10 }
  0x39   : > { %716 = vmatprep.mubr.f32.mxu0 %v1653_v7  ;;  %1471 = vmatpush1.bf16.msra.mxu0 %v1470_v14  ;;  %v348_v14 = vld [vmem:[%s1875_s8 + $0x70] sm:$0xff] }
  0x3a   : > { %1472 = vmatprep.subr.bf16.mxu0 %v1655_v0  ;;  %501 = vperm.xlu0 %1587, %v322_v18   ;;  %v352_v18 = vld [vmem:[%s1875_s8 + $0x90] sm:$0xff] }
  0x3b   : > { %506 = vperm.xlu1 %1588, %v323_v23   ;;  %1534 = vmatpush1.bf16.msra.mxu1 %v1485_v44  ;;  %v1060_v23 = vld [vmem:[%s2424_s5 + $0xe8] sm:$0xff] }
  0x3c   : > { %717 = vmatmul.mubr.f32.gmra.mrb[6].mxu0 %v337_v19  ;;  %1519 = vmatprep.subr.bf16.mxu1 %v1655_v0  ;;  %v353_v19 = vld [vmem:[%s1875_s8 + $0x98] sm:$0xff] }
  0x3d   : > { %722 = vmatprep.mubr.f32.mxu0 %v1653_v7  ;;  %1474 = vmatpush1.bf16.msra.mxu0 %v1473_v20  ;;  %v354_v20 = vld [vmem:[%s1875_s8 + $0xa0] sm:$0xff] }
  0x3e   : > { %1475 = vmatprep.subr.bf16.mxu0 %v1655_v0  ;;  %511 = vperm.xlu0 %1587, %v324_v24   ;;  %v1506_v24 = vpack.c.bf16 %v1060_v23, %v1059_v22 }
  0x3f   : > { %516 = vperm.xlu1 %1588, %v325_v29   ;;  %1535 = vmatpush1.bf16.msra.mxu1 %v1488_v50  ;;  %v357_v29 = vld [vmem:[%s1875_s8 + $0xb8] sm:$0xff] }
  0x40   : > { %723 = vmatmul.mubr.f32.gmra.mrb[8].mxu0 %v338_v25  ;;  %1520 = vmatprep.subr.bf16.mxu1 %v1655_v0  ;;  %v356_v25 = vld [vmem:[%s1875_s8 + $0xb0] sm:$0xff] }
  0x41   : > { %728 = vmatprep.mubr.f32.mxu0 %v1653_v7  ;;  %1477 = vmatpush1.bf16.msra.mxu0 %v1476_v26  ;;  %v1061_v26 = vld [vmem:[%s2424_s5 + $0xf0] sm:$0xff] }
  0x42   : > { %1478 = vmatprep.subr.bf16.mxu0 %v1655_v0  ;;  %521 = vperm.xlu0 %1587, %v326_v30   ;;  %v1509_v28 = vpack.c.bf16 %v1062_v27, %v1061_v26  ;;  %v358_v30 = vld [vmem:[%s1875_s8 + $0xc0] sm:$0xff] }
  0x43   : > { %526 = vperm.xlu1 %1588, %v327_v35   ;;  %1536 = vmatpush1.bf16.msra.mxu1 %v1491_v56 }
  0x44   : > { %729 = vmatmul.mubr.f32.gmra.mrb[10].mxu0 %v339_v31  ;;  %1521 = vmatprep.subr.bf16.mxu1 %v1655_v0  ;;  %v359_v31 = vld [vmem:[%s1875_s8 + $0xc8] sm:$0xff] }
  0x45   : > { %734 = vmatprep.mubr.f32.mxu0 %v1653_v7  ;;  %1480 = vmatpush1.bf16.msra.mxu0 %v1479_v32  ;;  %v361_v32 = vld [vmem:[%s1875_s8 + $0xd8] sm:$0xff] }
  0x46   : > { %1481 = vmatprep.subr.bf16.mxu0 %v1655_v0  ;;  %531 = vperm.xlu0 %1587, %v328_v36   ;;  %v363_v36 = vld [vmem:[%s1875_s8 + $0xe8] sm:$0xff] }
  0x47   : > { %536 = vperm.xlu1 %1588, %v329_v41   ;;  %1537 = vmatpush1.bf16.msra.mxu1 %v1494_v62  ;;  %v365_v41 = vld [vmem:[%s1875_s8 + $0xf8] sm:$0xff] }
  0x48   : > { %735 = vmatmul.mubr.f32.gmra.mrb[12].mxu0 %v340_v37  ;;  %1522 = vmatprep.subr.bf16.mxu1 %v1655_v0 }
  0x49   : > { %740 = vmatprep.mubr.f32.mxu0 %v1653_v7  ;;  %1483 = vmatpush1.bf16.msra.mxu0 %v1482_v38  ;;  %v364_v38 = vld [vmem:[%s1875_s8 + $0xf0] sm:$0xff] }
  0x4a   : > { %1484 = vmatprep.subr.bf16.mxu0 %v1655_v0  ;;  %401 = vperm.xlu0 %1587, %v302_v42   ;;  %v561_v42 = vshrl.u32 %v560_v39, 7 }
  0x4b   : > { %541 = vperm.xlu1 %1588, %v330_v47   ;;  %1538 = vmatpush1.bf16.msra.mxu1 %v1497_v4 }
  0x4c   : > { %741 = vmatmul.mubr.f32.gmra.mrb[14].mxu0 %v341_v43  ;;  %1523 = vmatprep.subr.bf16.mxu1 %v1655_v0  ;;  %v566_v45 = vsub.s32 1, %v561_v42 }
  0x4d   : > { %746 = vmatprep.mubr.f32.mxu0 %v1653_v7  ;;  %1486 = vmatpush1.bf16.msra.mxu0 %v1485_v44  ;;  %v562_v44 = vsub.s32 0, %v561_v42 }
  0x4e   : > { %1487 = vmatprep.subr.bf16.mxu0 %v1655_v0  ;;  %406 = vperm.xlu0 %1587, %v303_v48  }
  0x4f   : > { %546 = vperm.xlu1 %1588, %v331_v53   ;;  %1539 = vmatpush1.bf16.msra.mxu1 %v1500_v9  ;;  %v2106_v48 = vrot.slane %v398_v46, %v562_v44  ;;  %v2151_v10 = vrot.slane %v891_v6, %v562_v44 }
  0x50   : > { %747 = vmatmul.mubr.f32.gmra.mrb[16].mxu0 %v342_v49  ;;  %1524 = vmatprep.subr.bf16.mxu1 %v1655_v0  ;;  %v2108_v49 = vrot.slane %v398_v46, %v566_v45 }
  0x51   : > { %752 = vmatprep.mubr.f32.mxu0 %v1653_v7  ;;  %1489 = vmatpush1.bf16.msra.mxu0 %v1488_v50 }
  0x52   : > { %1490 = vmatprep.subr.bf16.mxu0 %v1655_v0  ;;  %411 = vperm.xlu0 %1587, %v304_v54  }
  0x53   : > { %551 = vperm.xlu1 %1588, %v332_v59   ;;  %1540 = vmatpush1.bf16.msra.mxu1 %v1503_v13 }
  0x54   : > { %753 = vmatmul.mubr.f32.gmra.mrb[18].mxu0 %v343_v55  ;;  %1525 = vmatprep.subr.bf16.mxu1 %v1655_v0 }
  0x55   : > { %758 = vmatprep.mubr.f32.mxu0 %v1653_v7  ;;  %1492 = vmatpush1.bf16.msra.mxu0 %v1491_v56 }
  0x56   : > { %1493 = vmatprep.subr.bf16.mxu0 %v1655_v0  ;;  %416 = vperm.xlu0 %1587, %v305_v60  }
  0x57   : > { %556 = vperm.xlu1 %1588, %v333_v2   ;;  %1541 = vmatpush1.bf16.msra.mxu1 %v1506_v24 }
  0x58   : > { %759 = vmatmul.mubr.f32.gmra.mrb[20].mxu0 %v344_v61  ;;  %1526 = vmatprep.subr.bf16.mxu1 %v1655_v0 }
  0x59   : > { %764 = vmatprep.mubr.f32.mxu0 %v1653_v7  ;;  %1495 = vmatpush1.bf16.msra.mxu0 %v1494_v62 }
  0x5a   : > { %1496 = vmatprep.subr.bf16.mxu0 %v1655_v0 }
  0x5b   : > { %1542 = vmatpush1.bf16.msra.mxu1 %v1509_v28 }
  0x5c   : > { %765 = vmatmul.mubr.f32.gmra.mrb[22].mxu0 %v345_v3 }
  0x5d   : > { %770 = vmatprep.mubr.f32.mxu0 %v1653_v7  ;;  %1498 = vmatpush1.bf16.msra.mxu0 %v1497_v4 }
  0x5e   : > { %1499 = vmatprep.subr.bf16.mxu0 %v1655_v0 }
  0x60   : > { %771 = vmatmul.mubr.f32.gmra.mrb[24].mxu0 %v346_v8 }
  0x61   : > { %776 = vmatprep.mubr.f32.mxu0 %v1653_v7  ;;  %1501 = vmatpush1.bf16.msra.mxu0 %v1500_v9 }
  0x62   : > { %1502 = vmatprep.subr.bf16.mxu0 %v1655_v0 }
  0x64   : > { %777 = vmatmul.mubr.f32.gmra.mrb[26].mxu0 %v347_v12  ;;  %v2153_v12 = vrot.slane %v891_v6, %v566_v45 }
  0x65   : > { %782 = vmatprep.mubr.f32.mxu0 %v1653_v7  ;;  %1504 = vmatpush1.bf16.msra.mxu0 %v1503_v13 }
  0x66   : > { %1505 = vmatprep.subr.bf16.mxu0 %v1655_v0 }
  0x68   : > { %783 = vmatmul.mubr.f32.gmra.mrb[28].mxu0 %v348_v14 }
  0x69   : > { %788 = vmatprep.mubr.f32.mxu0 %v1653_v7  ;;  %1507 = vmatpush1.bf16.msra.mxu0 %v1506_v24 }
  0x6a   : > { %1508 = vmatprep.subr.bf16.mxu0 %v1655_v0  ;;  %v360_v0 = vld [vmem:[%s1875_s8 + $0xd0] sm:$0xff]  ;;  %s1593_s8 = sshll.u32 %s1656_s15, 4  ;;  %s1594_s8 = int_to_ptr.vmem [resolvable:$false] %s1593_s8 }
  0x6b   : > { %s1595_s21 = scalar_lea.vmem %s1594_s8, 8192  ;;  %p1596_p0 = scmp.lt.s32.totalorder %s2372_s29, %s1594_s8 }
  0x6c   : > { %789 = vmatmul.mubr.f32.gmra.mrb[30].mxu0 %v349_v15  ;;  %p1597_p1 = scmp.lt.s32.totalorder %s1595_s21, %s1589_s28 }
  0x6d   : > { %794 = vmatprep.mubr.f32.mxu0 %v1653_v7  ;;  %1510 = vmatpush1.bf16.msra.mxu0 %v1509_v28 }
  0x6e   : > { %p1598_p2 = por %p1597_p1, %p1596_p0 }
  0x70   : > { %795 = vmatmul.mubr.f32.gmra.mrb[32].mxu0 %v350_v16  ;;  %p1599_p3 = pnand %p1598_p2, %p1592_p13 }
  0x71   : > { %800 = vmatprep.mubr.f32.mxu0 %v1653_v7 }
  0x74   : > { %801 = vmatmul.mubr.f32.gmra.mrb[34].mxu0 %v351_v17 }
  0x75   : > { %806 = vmatprep.mubr.f32.mxu0 %v1653_v7 }
  0x78   : > { %807 = vmatmul.mubr.f32.gmra.mrb[36].mxu0 %v352_v18 }
  0x79   : > { %812 = vmatprep.mubr.f32.mxu0 %v1653_v7 }
  0x7c   : > { %813 = vmatmul.mubr.f32.gmra.mrb[38].mxu0 %v353_v19 }
  0x7d   : > { %818 = vmatprep.mubr.f32.mxu0 %v1653_v7 }
  0x80   : > { %819 = vmatmul.mubr.f32.gmra.mrb[40].mxu0 %v354_v20 }
  0x81   : > { %824 = vmatprep.mubr.f32.mxu0 %v1653_v7 }
  0x84   : > { %825 = vmatmul.mubr.f32.gmra.mrb[42].mxu0 %v355_v21 }
  0x85   : > { %830 = vmatprep.mubr.f32.mxu0 %v1653_v7 }
  0x88   : > { %831 = vmatmul.mubr.f32.gmra.mrb[44].mxu0 %v356_v25 }
  0x89   : > { %836 = vmatprep.mubr.f32.mxu0 %v1653_v7 }
  0x8c   : > { %837 = vmatmul.mubr.f32.gmra.mrb[46].mxu0 %v357_v29 }
  0x8d   : > { %842 = vmatprep.mubr.f32.mxu0 %v1653_v7 }
  0x90   : > { %843 = vmatmul.mubr.f32.gmra.mrb[48].mxu0 %v358_v30 }
  0x91   : > { %848 = vmatprep.mubr.f32.mxu0 %v1653_v7 }
  0x94   : > { %849 = vmatmul.mubr.f32.gmra.mrb[50].mxu0 %v359_v31 }
  0x95   : > { %854 = vmatprep.mubr.f32.mxu0 %v1653_v7 }
  0x98   : > { %855 = vmatmul.mubr.f32.gmra.mrb[52].mxu0 %v360_v0  ;;  %v2083_v33 = vpop.permute.xlu0 %421 }
  0x99   : > { %860 = vmatprep.mubr.f32.mxu0 %v1653_v7 }
  0x9c   : > { %861 = vmatmul.mubr.f32.gmra.mrb[54].mxu0 %v361_v32  ;;  %v2087_v35 = vpop.permute.xlu0 %426 }
  0x9d   : > { %866 = vmatprep.mubr.f32.mxu0 %v1653_v7 }
  0xa0   : > { %867 = vmatmul.mubr.f32.gmra.mrb[56].mxu0 %v362_v34  ;;  %v2091_v37 = vpop.permute.xlu0 %441 }
  0xa1   : > { %872 = vmatprep.mubr.f32.mxu0 %v1653_v7 }
  0xa4   : > { %873 = vmatmul.mubr.f32.gmra.mrb[58].mxu0 %v363_v36  ;;  %v2095_v40 = vpop.permute.xlu0 %451 }
  0xa5   : > { %878 = vmatprep.mubr.f32.mxu0 %v1653_v7 }
  0xa8   : > { %879 = vmatmul.mubr.f32.gmra.mrb[60].mxu0 %v364_v38  ;;  %v2099_v43 = vpop.permute.xlu0 %461 }
  0xa9   : > { %884 = vmatprep.mubr.f32.mxu0 %v1653_v7 }
  0xac   : > { %885 = vmatmul.mubr.f32.gmra.mrb[62].mxu0 %v365_v41  ;;  %v2104_v47 = vpop.permute.xlu0 %471 }
  0xb1   : > { %v482_v50 = vpop.permute.xlu0 %481 }
  0xb2   : > { %v2111_v7 = vmul.f32 %v2106_v48, %v482_v50  ;;  %v2114_v51 = vmul.f32 %v2108_v49, %v482_v50  ;;  %v578_v50 = vmul.f32 %v2106_v48, %v2083_v33 }
  0xb5   : > { %v492_v52 = vpop.permute.xlu0 %491 }
  0xb6   : > { %v2117_v53 = vmul.f32 %v2106_v48, %v492_v52  ;;  %v2120_v54 = vmul.f32 %v2108_v49, %v492_v52 }
  0xb9   : > { %v502_v55 = vpop.permute.xlu0 %501 }
  0xba   : > { %v2123_v56 = vmul.f32 %v2106_v48, %v502_v55  ;;  %v2126_v57 = vmul.f32 %v2108_v49, %v502_v55 }
  0xbd   : > { %v512_v58 = vpop.permute.xlu0 %511 }
  0xbe   : > { %v2129_v59 = vmul.f32 %v2106_v48, %v512_v58  ;;  %v2132_v60 = vmul.f32 %v2108_v49, %v512_v58  ;;  %v579_v58 = vmul.f32 %v2108_v49, %v2083_v33 }
  0xc1   : > { %v522_v61 = vpop.permute.xlu0 %521 }
  0xc2   : > { %v2135_v62 = vmul.f32 %v2106_v48, %v522_v61  ;;  %v2138_v63 = vmul.f32 %v2108_v49, %v522_v61 }
  0xc5   : > { %v532_v1 = vpop.permute.xlu0 %531 }
  0xc6   : > { %v2141_v2 = vmul.f32 %v2106_v48, %v532_v1  ;;  %v2144_v3 = vmul.f32 %v2108_v49, %v532_v1 }
  0xc9   : > { %v402_v4 = vpop.permute.xlu0 %401 }
  0xca   : > { %v570_v8 = vmul.f32 %v2106_v48, %v402_v4  ;;  %v571_v9 = vmul.f32 %v2108_v49, %v402_v4 }
  0xcd   : > { %v407_v5 = vpop.permute.xlu0 %406 }
  0xce   : > { %v572_v16 = vmul.f32 %v2106_v48, %v407_v5  ;;  %v573_v18 = vmul.f32 %v2108_v49, %v407_v5 }
  0xd1   : > { %v412_v13 = vpop.permute.xlu0 %411 }
  0xd2   : > { %v574_v24 = vmul.f32 %v2106_v48, %v412_v13  ;;  %v575_v27 = vmul.f32 %v2108_v49, %v412_v13 }
  0xd5   : > { %v417_v28 = vpop.permute.xlu0 %416 }
  0xd6   : > { %v576_v36 = vmul.f32 %v2106_v48, %v417_v28  ;;  %v577_v41 = vmul.f32 %v2108_v49, %v417_v28 }
 0x103   : > { %v700_v11 = vpop.f32.mrb[0].mxu0 }
 0x104   : > { %v701_v14 = vadd.f32 %v700_v11, %v570_v8  ;;  %v702_v15 = vpop.f32.mrb[1].mxu0 }
 0x105   : > { %v703_v17 = vadd.f32 %v702_v15, %v571_v9  ;;  %v580_v15 = vmul.f32 %v2106_v48, %v2087_v35 }
 0x106   : > { %v903_v19 = vadd.f32 %v2151_v10, %v701_v14 }
 0x107   : > { %v904_v20 = vadd.f32 %v2153_v12, %v703_v17  ;;  %v706_v21 = vpop.f32.mrb[2].mxu0  ;;  %v581_v17 = vmul.f32 %v2108_v49, %v2087_v35 }
 0x108   : > { %v707_v22 = vadd.f32 %v706_v21, %v572_v16  ;;  %v708_v23 = vpop.f32.mrb[3].mxu0  ;;  %v967_v29 = vmax.f32 %v903_v19, 0.0 }
 0x109   : > { %v968_v25 = vmax.f32 %v904_v20, 0.0  ;;  %v709_v26 = vadd.f32 %v708_v23, %v573_v18  ;;  %v432_v18 = vpop.permute.xlu1 %431 }
 0x10a   : > { %v905_v30 = vadd.f32 %v2151_v10, %v707_v22  ;;  %v582_v21 = vmul.f32 %v2106_v48, %v432_v18 }
 0x10b   : > { %v906_v31 = vadd.f32 %v2153_v12, %v709_v26  ;;  %v712_v0 = vpop.f32.mrb[4].mxu0  ;;  %1134 = vmatprep.mubr.f32.mxu0 %v968_v25 }
 0x10c   : > { %v713_v32 = vadd.f32 %v712_v0, %v574_v24  ;;  %v714_v34 = vpop.f32.mrb[5].mxu0  ;;  %1135 = vmatmul.mubr.f32.vlgmr.msra.gmra.mrb[64].mxu0 %v967_v29  ;;  %v969_v42 = vmax.f32 %v905_v30, 0.0  ;;  %v583_v24 = vmul.f32 %v2108_v49, %v432_v18 }
 0x10d   : > { %v970_v38 = vmax.f32 %v906_v31, 0.0  ;;  %v715_v39 = vadd.f32 %v714_v34, %v575_v27  ;;  %v437_v0 = vpop.permute.xlu1 %436 }
 0x10e   : > { %v907_v44 = vadd.f32 %v2151_v10, %v713_v32 }
 0x10f   : > { %v908_v45 = vadd.f32 %v2153_v12, %v715_v39  ;;  %v718_v46 = vpop.f32.mrb[6].mxu0  ;;  %1139 = vmatprep.mubr.f32.mxu0 %v970_v38 }
 0x110   : > { %v719_v52 = vadd.f32 %v718_v46, %v576_v36  ;;  %v720_v55 = vpop.f32.mrb[7].mxu0  ;;  %1140 = vmatmul.mubr.f32.gmra.mrb[66].mxu0 %v969_v42  ;;  %v971_v4 = vmax.f32 %v907_v44, 0.0  ;;  %v584_v36 = vmul.f32 %v2106_v48, %v437_v0 }
 0x111   : > { %v972_v61 = vmax.f32 %v908_v45, 0.0  ;;  %v721_v1 = vadd.f32 %v720_v55, %v577_v41  ;;  %v585_v41 = vmul.f32 %v2108_v49, %v437_v0  ;;  %v586_v55 = vmul.f32 %v2106_v48, %v2091_v37 }
 0x112   : > { %v909_v5 = vadd.f32 %v2151_v10, %v719_v52 }
 0x113   : > { %v910_v6 = vadd.f32 %v2153_v12, %v721_v1  ;;  %v724_v8 = vpop.f32.mrb[8].mxu0  ;;  %1144 = vmatprep.mubr.f32.mxu0 %v972_v61  ;;  %v587_v1 = vmul.f32 %v2108_v49, %v2091_v37 }
 0x114   : > { %v725_v9 = vadd.f32 %v724_v8, %v578_v50  ;;  %v726_v11 = vpop.f32.mrb[9].mxu0  ;;  %1145 = vmatmul.mubr.f32.gmra.mrb[68].mxu0 %v971_v4  ;;  %v973_v16 = vmax.f32 %v909_v5, 0.0 }
 0x115   : > { %v974_v13 = vmax.f32 %v910_v6, 0.0  ;;  %v727_v14 = vadd.f32 %v726_v11, %v579_v58 }
 0x116   : > { %v911_v33 = vadd.f32 %v2151_v10, %v725_v9  ;;  %v447_v9 = vpop.permute.xlu1 %446 }
 0x117   : > { %v730_v19 = vpop.f32.mrb[10].mxu0  ;;  %1149 = vmatprep.mubr.f32.mxu0 %v974_v13  ;;  %v912_v20 = vadd.f32 %v2153_v12, %v727_v14  ;;  %v588_v14 = vmul.f32 %v2106_v48, %v447_v9 }
 0x118   : > { %v731_v22 = vadd.f32 %v730_v19, %v580_v15  ;;  %v732_v23 = vpop.f32.mrb[11].mxu0  ;;  %1150 = vmatmul.mubr.f32.gmra.mrb[70].mxu0 %v973_v16  ;;  %v975_v27 = vmax.f32 %v911_v33, 0.0  ;;  %v589_v33 = vmul.f32 %v2108_v49, %v447_v9 }
 0x119   : > { %v733_v25 = vadd.f32 %v732_v23, %v581_v17  ;;  %v976_v26 = vmax.f32 %v912_v20, 0.0 }
 0x11a   : > { %v913_v28 = vadd.f32 %v2151_v10, %v731_v22  ;;  %v590_v22 = vmul.f32 %v2106_v48, %v2095_v40 }
 0x11b   : > { %v914_v29 = vadd.f32 %v2153_v12, %v733_v25  ;;  %v736_v35 = vpop.f32.mrb[12].mxu0  ;;  %1154 = vmatprep.mubr.f32.mxu1 %v976_v26  ;;  %v591_v25 = vmul.f32 %v2108_v49, %v2095_v40 }
 0x11c   : > { %v737_v30 = vadd.f32 %v736_v35, %v582_v21  ;;  %v738_v31 = vpop.f32.mrb[13].mxu0  ;;  %1155 = vmatmul.mubr.f32.vlgmr.msra.gmra.mrb[0].mxu1 %v975_v27  ;;  %v977_v38 = vmax.f32 %v913_v28, 0.0  ;;  %v457_v35 = vpop.permute.xlu1 %456 }
 0x11d   : > { %v978_v32 = vmax.f32 %v914_v29, 0.0  ;;  %v739_v34 = vadd.f32 %v738_v31, %v583_v24  ;;  %v592_v0 = vmul.f32 %v2106_v48, %v457_v35 }
 0x11e   : > { %v915_v39 = vadd.f32 %v2151_v10, %v737_v30 }
 0x11f   : > { %v916_v42 = vadd.f32 %v2153_v12, %v739_v34  ;;  %v742_v44 = vpop.f32.mrb[14].mxu0  ;;  %1159 = vmatprep.mubr.f32.mxu1 %v978_v32 }
 0x120   : > { %v743_v45 = vadd.f32 %v742_v44, %v584_v36  ;;  %v744_v46 = vpop.f32.mrb[15].mxu0  ;;  %1160 = vmatmul.mubr.f32.gmra.mrb[2].mxu1 %v977_v38  ;;  %v979_v58 = vmax.f32 %v915_v39, 0.0  ;;  %v593_v36 = vmul.f32 %v2108_v49, %v457_v35 }
 0x121   : > { %v980_v50 = vmax.f32 %v916_v42, 0.0  ;;  %v745_v52 = vadd.f32 %v744_v46, %v585_v41 }
 0x122   : > { %v917_v61 = vadd.f32 %v2151_v10, %v743_v45  ;;  %v594_v45 = vmul.f32 %v2106_v48, %v2099_v43 }
 0x123   : > { %v918_v4 = vadd.f32 %v2153_v12, %v745_v52  ;;  %v748_v5 = vpop.f32.mrb[16].mxu0  ;;  %1164 = vmatprep.mubr.f32.mxu1 %v980_v50  ;;  %v595_v52 = vmul.f32 %v2108_v49, %v2099_v43 }
 0x124   : > { %v749_v6 = vadd.f32 %v748_v5, %v586_v55  ;;  %v750_v8 = vpop.f32.mrb[17].mxu0  ;;  %1165 = vmatmul.mubr.f32.gmra.mrb[4].mxu1 %v979_v58  ;;  %v981_v15 = vmax.f32 %v917_v61, 0.0 }
 0x125   : > { %v982_v11 = vmax.f32 %v918_v4, 0.0  ;;  %v751_v13 = vadd.f32 %v750_v8, %v587_v1  ;;  %v467_v4 = vpop.permute.xlu1 %466 }
 0x126   : > { %v919_v16 = vadd.f32 %v2151_v10, %v749_v6  ;;  %v596_v8 = vmul.f32 %v2106_v48, %v467_v4 }
 0x127   : > { %v920_v17 = vadd.f32 %v2153_v12, %v751_v13  ;;  %v754_v37 = vpop.f32.mrb[18].mxu0  ;;  %1169 = vmatprep.mubr.f32.mxu1 %v982_v11  ;;  %v597_v13 = vmul.f32 %v2108_v49, %v467_v4 }
 0x128   : > { %v755_v18 = vadd.f32 %v754_v37, %v588_v14  ;;  %v756_v19 = vpop.f32.mrb[19].mxu0  ;;  %1170 = vmatmul.mubr.f32.gmra.mrb[6].mxu1 %v981_v15  ;;  %v983_v23 = vmax.f32 %v919_v16, 0.0  ;;  %v598_v37 = vmul.f32 %v2106_v48, %v2104_v47 }
 0x129   : > { %v984_v20 = vmax.f32 %v920_v17, 0.0  ;;  %v757_v21 = vadd.f32 %v756_v19, %v589_v33 }
 0x12a   : > { %v921_v24 = vadd.f32 %v2151_v10, %v755_v18 }
 0x12b   : > { %v922_v26 = vadd.f32 %v2153_v12, %v757_v21  ;;  %v760_v27 = vpop.f32.mrb[20].mxu0  ;;  %1174 = vmatprep.mubr.f32.mxu1 %v984_v20  ;;  %v599_v20 = vmul.f32 %v2108_v49, %v2104_v47 }
 0x12c   : > { %v761_v28 = vadd.f32 %v760_v27, %v590_v22  ;;  %v762_v29 = vpop.f32.mrb[21].mxu0  ;;  %1175 = vmatmul.mubr.f32.gmra.mrb[8].mxu1 %v983_v23  ;;  %v985_v32 = vmax.f32 %v921_v24, 0.0 }
 0x12d   : > { %v986_v30 = vmax.f32 %v922_v26, 0.0  ;;  %v763_v31 = vadd.f32 %v762_v29, %v591_v25  ;;  %v477_v25 = vpop.permute.xlu1 %476 }
 0x12e   : > { %v923_v34 = vadd.f32 %v2151_v10, %v761_v28  ;;  %v600_v28 = vmul.f32 %v2106_v48, %v477_v25 }
 0x12f   : > { %v924_v38 = vadd.f32 %v2153_v12, %v763_v31  ;;  %v766_v40 = vpop.f32.mrb[22].mxu0  ;;  %1179 = vmatprep.mubr.f32.mxu1 %v986_v30  ;;  %v601_v30 = vmul.f32 %v2108_v49, %v477_v25 }
 0x130   : > { %v767_v39 = vadd.f32 %v766_v40, %v592_v0  ;;  %v768_v41 = vpop.f32.mrb[23].mxu0  ;;  %1180 = vmatmul.mubr.f32.gmra.mrb[10].mxu1 %v985_v32  ;;  %v987_v46 = vmax.f32 %v923_v34, 0.0 }
 0x131   : > { %v988_v42 = vmax.f32 %v924_v38, 0.0  ;;  %v769_v44 = vadd.f32 %v768_v41, %v593_v36 }
 0x132   : > { %v925_v50 = vadd.f32 %v2151_v10, %v767_v39 }
 0x133   : > { %v926_v55 = vadd.f32 %v2153_v12, %v769_v44  ;;  %v772_v58 = vpop.f32.mrb[24].mxu0  ;;  %1184 = vmatprep.mubr.f32.mxu1 %v988_v42 }
 0x134   : > { %v773_v61 = vadd.f32 %v772_v58, %v594_v45  ;;  %v774_v1 = vpop.f32.mrb[25].mxu0  ;;  %1185 = vmatmul.mubr.f32.gmra.mrb[12].mxu1 %v987_v46  ;;  %v989_v9 = vmax.f32 %v925_v50, 0.0  ;;  %v487_v45 = vpop.permute.xlu1 %486 }
 0x135   : > { %v990_v5 = vmax.f32 %v926_v55, 0.0  ;;  %v775_v6 = vadd.f32 %v774_v1, %v595_v52  ;;  %v604_v52 = vmul.f32 %v2106_v48, %v487_v45 }
 0x136   : > { %v927_v11 = vadd.f32 %v2151_v10, %v773_v61  ;;  %v605_v61 = vmul.f32 %v2108_v49, %v487_v45 }
 0x137   : > { %v928_v14 = vadd.f32 %v2153_v12, %v775_v6  ;;  %v778_v43 = vpop.f32.mrb[26].mxu0  ;;  %1189 = vmatprep.mubr.f32.mxu1 %v990_v5 }
 0x138   : > { %v779_v15 = vadd.f32 %v778_v43, %v596_v8  ;;  %v780_v16 = vpop.f32.mrb[27].mxu0  ;;  %1190 = vmatmul.mubr.f32.gmra.mrb[14].mxu1 %v989_v9  ;;  %v991_v18 = vmax.f32 %v927_v11, 0.0 }
 0x139   : > { %v992_v33 = vmax.f32 %v928_v14, 0.0  ;;  %v781_v17 = vadd.f32 %v780_v16, %v597_v13 }
 0x13a   : > { %v929_v19 = vadd.f32 %v2151_v10, %v779_v15 }
 0x13b   : > { %v930_v21 = vadd.f32 %v2153_v12, %v781_v17  ;;  %v784_v22 = vpop.f32.mrb[28].mxu0  ;;  %1194 = vmatprep.mubr.f32.mxu1 %v992_v33 }
 0x13c   : > { %v785_v23 = vadd.f32 %v784_v22, %v598_v37  ;;  %v786_v24 = vpop.f32.mrb[29].mxu0  ;;  %1195 = vmatmul.mubr.f32.gmra.mrb[16].mxu1 %v991_v18  ;;  %v993_v29 = vmax.f32 %v929_v19, 0.0 }
 0x13d   : > { %v994_v26 = vmax.f32 %v930_v21, 0.0  ;;  %v787_v27 = vadd.f32 %v786_v24, %v599_v20 }
 0x13e   : > { %v931_v35 = vadd.f32 %v2151_v10, %v785_v23 }
 0x13f   : > { %v932_v31 = vadd.f32 %v2153_v12, %v787_v27  ;;  %v790_v47 = vpop.f32.mrb[30].mxu0  ;;  %1199 = vmatprep.mubr.f32.mxu1 %v994_v26 }
 0x140   : > { %v791_v0 = vadd.f32 %v790_v47, %v600_v28  ;;  %v792_v32 = vpop.f32.mrb[31].mxu0  ;;  %1200 = vmatmul.mubr.f32.gmra.mrb[18].mxu1 %v993_v29  ;;  %v995_v38 = vmax.f32 %v931_v35, 0.0 }
 0x141   : > { %v996_v34 = vmax.f32 %v932_v31, 0.0  ;;  %v793_v36 = vadd.f32 %v792_v32, %v601_v30 }
 0x142   : > { %v933_v40 = vadd.f32 %v2151_v10, %v791_v0 }
 0x143   : > { %v934_v39 = vadd.f32 %v2153_v12, %v793_v36  ;;  %v796_v41 = vpop.f32.mrb[32].mxu0  ;;  %1204 = vmatprep.mubr.f32.mxu1 %v996_v34 }
 0x144   : > { %v797_v42 = vadd.f32 %v796_v41, %v2111_v7  ;;  %v798_v44 = vpop.f32.mrb[33].mxu0  ;;  %1205 = vmatmul.mubr.f32.gmra.mrb[20].mxu1 %v995_v38  ;;  %v997_v55 = vmax.f32 %v933_v40, 0.0 }
 0x145   : > { %v998_v46 = vmax.f32 %v934_v39, 0.0  ;;  %v799_v50 = vadd.f32 %v798_v44, %v2114_v51  ;;  %v497_v51 = vpop.permute.xlu1 %496 }
 0x146   : > { %v935_v58 = vadd.f32 %v2151_v10, %v797_v42  ;;  %v608_v17 = vmul.f32 %v2106_v48, %v497_v51  ;;  %v609_v19 = vmul.f32 %v2108_v49, %v497_v51 }
 0x147   : > { %v936_v1 = vadd.f32 %v2153_v12, %v799_v50  ;;  %v802_v4 = vpop.f32.mrb[34].mxu0  ;;  %1209 = vmatprep.mubr.f32.mxu1 %v998_v46 }
 0x148   : > { %v803_v5 = vadd.f32 %v802_v4, %v604_v52  ;;  %v804_v6 = vpop.f32.mrb[35].mxu0  ;;  %1210 = vmatmul.mubr.f32.gmra.mrb[22].mxu1 %v997_v55  ;;  %v999_v9 = vmax.f32 %v935_v58, 0.0 }
 0x149   : > { %v1000_v7 = vmax.f32 %v936_v1, 0.0  ;;  %v805_v8 = vadd.f32 %v804_v6, %v605_v61 }
 0x14a   : > { %v937_v11 = vadd.f32 %v2151_v10, %v803_v5 }
 0x14b   : > { %v938_v13 = vadd.f32 %v2153_v12, %v805_v8  ;;  %v808_v14 = vpop.f32.mrb[36].mxu0  ;;  %1214 = vmatprep.mubr.f32.mxu1 %v1000_v7 }
 0x14c   : > { %v809_v43 = vadd.f32 %v808_v14, %v2117_v53  ;;  %v810_v15 = vpop.f32.mrb[37].mxu0  ;;  %1215 = vmatmul.mubr.f32.gmra.mrb[24].mxu1 %v999_v9  ;;  %v1001_v37 = vmax.f32 %v937_v11, 0.0  ;;  %v507_v53 = vpop.permute.xlu1 %506 }
 0x14d   : > { %v1002_v16 = vmax.f32 %v938_v13, 0.0  ;;  %v811_v33 = vadd.f32 %v810_v15, %v2120_v54  ;;  %v612_v47 = vmul.f32 %v2106_v48, %v507_v53  ;;  %v613_v34 = vmul.f32 %v2108_v49, %v507_v53 }
 0x14e   : > { %v939_v18 = vadd.f32 %v2151_v10, %v809_v43 }
 0x14f   : > { %v940_v20 = vadd.f32 %v2153_v12, %v811_v33  ;;  %v814_v21 = vpop.f32.mrb[38].mxu0  ;;  %1219 = vmatprep.mubr.f32.mxu1 %v1002_v16 }
 0x150   : > { %v815_v22 = vadd.f32 %v814_v21, %v608_v17  ;;  %v816_v23 = vpop.f32.mrb[39].mxu0  ;;  %1220 = vmatmul.mubr.f32.gmra.mrb[26].mxu1 %v1001_v37  ;;  %v1003_v26 = vmax.f32 %v939_v18, 0.0  ;;  %v517_v36 = vpop.permute.xlu1 %516 }
 0x151   : > { %v1004_v24 = vmax.f32 %v940_v20, 0.0  ;;  %v817_v25 = vadd.f32 %v816_v23, %v609_v19  ;;  %v616_v1 = vmul.f32 %v2106_v48, %v517_v36  ;;  %v617_v6 = vmul.f32 %v2108_v49, %v517_v36 }
 0x152   : > { %v941_v54 = vadd.f32 %v2151_v10, %v815_v22 }
 0x153   : > { %v942_v27 = vadd.f32 %v2153_v12, %v817_v25  ;;  %v820_v28 = vpop.f32.mrb[40].mxu0  ;;  %1224 = vmatprep.mubr.f32.mxu1 %v1004_v24 }
 0x154   : > { %v821_v29 = vadd.f32 %v820_v28, %v2123_v56  ;;  %v822_v35 = vpop.f32.mrb[41].mxu0  ;;  %1225 = vmatmul.mubr.f32.gmra.mrb[28].mxu1 %v1003_v26  ;;  %v1005_v0 = vmax.f32 %v941_v54, 0.0  ;;  %v527_v55 = vpop.permute.xlu1 %526 }
 0x155   : > { %v1006_v30 = vmax.f32 %v942_v27, 0.0  ;;  %v823_v31 = vadd.f32 %v822_v35, %v2126_v57  ;;  %v620_v18 = vmul.f32 %v2106_v48, %v527_v55  ;;  %v621_v21 = vmul.f32 %v2108_v49, %v527_v55 }
 0x156   : > { %v943_v32 = vadd.f32 %v2151_v10, %v821_v29 }
 0x157   : > { %v944_v38 = vadd.f32 %v2153_v12, %v823_v31  ;;  %v826_v40 = vpop.f32.mrb[42].mxu0  ;;  %1229 = vmatprep.mubr.f32.mxu1 %v1006_v30 }
 0x158   : > { %v827_v39 = vadd.f32 %v826_v40, %v612_v47  ;;  %v828_v41 = vpop.f32.mrb[43].mxu0  ;;  %1230 = vmatmul.mubr.f32.gmra.mrb[30].mxu1 %v1005_v0  ;;  %v1007_v44 = vmax.f32 %v943_v32, 0.0 }
 0x159   : > { %v1008_v56 = vmax.f32 %v944_v38, 0.0  ;;  %v829_v42 = vadd.f32 %v828_v41, %v613_v34 }
 0x15a   : > { %v945_v57 = vadd.f32 %v2151_v10, %v827_v39 }
 0x15b   : > { %v946_v45 = vadd.f32 %v2153_v12, %v829_v42  ;;  %v832_v46 = vpop.f32.mrb[44].mxu0  ;;  %1234 = vmatprep.mubr.f32.mxu1 %v1008_v56 }
 0x15c   : > { %v833_v50 = vadd.f32 %v832_v46, %v2129_v59  ;;  %v834_v52 = vpop.f32.mrb[45].mxu0  ;;  %1235 = vmatmul.mubr.f32.gmra.mrb[32].mxu1 %v1007_v44  ;;  %v1009_v4 = vmax.f32 %v945_v57, 0.0 }
 0x15d   : > { %v1010_v58 = vmax.f32 %v946_v45, 0.0  ;;  %v835_v61 = vadd.f32 %v834_v52, %v2132_v60  ;;  %v537_v60 = vpop.permute.xlu1 %536 }
 0x15e   : > { %v947_v5 = vadd.f32 %v2151_v10, %v833_v50  ;;  %v624_v47 = vmul.f32 %v2106_v48, %v537_v60  ;;  %v625_v34 = vmul.f32 %v2108_v49, %v537_v60 }
 0x15f   : > { %v948_v7 = vadd.f32 %v2153_v12, %v835_v61  ;;  %v838_v8 = vpop.f32.mrb[46].mxu0  ;;  %1239 = vmatprep.mubr.f32.mxu1 %v1010_v58 }
 0x160   : > { %v839_v9 = vadd.f32 %v838_v8, %v616_v1  ;;  %v840_v11 = vpop.f32.mrb[47].mxu0  ;;  %1240 = vmatmul.mubr.f32.gmra.mrb[34].mxu1 %v1009_v4  ;;  %v1011_v13 = vmax.f32 %v947_v5, 0.0 }
 0x161   : > { %v1012_v59 = vmax.f32 %v948_v7, 0.0  ;;  %v841_v51 = vadd.f32 %v840_v11, %v617_v6 }
 0x162   : > { %v949_v14 = vadd.f32 %v2151_v10, %v839_v9 }
 0x163   : > { %v950_v43 = vadd.f32 %v2153_v12, %v841_v51  ;;  %v844_v15 = vpop.f32.mrb[48].mxu0  ;;  %1244 = vmatprep.mubr.f32.mxu1 %v1012_v59 }
 0x164   : > { %v845_v16 = vadd.f32 %v844_v15, %v2135_v62  ;;  %v846_v33 = vpop.f32.mrb[49].mxu0  ;;  %1245 = vmatmul.mubr.f32.gmra.mrb[36].mxu1 %v1011_v13  ;;  %v1013_v19 = vmax.f32 %v949_v14, 0.0  ;;  %v542_v62 = vpop.permute.xlu1 %541 }
 0x165   : > { %v1014_v17 = vmax.f32 %v950_v43, 0.0  ;;  %v847_v37 = vadd.f32 %v846_v33, %v2138_v63  ;;  %v626_v42 = vmul.f32 %v2106_v48, %v542_v62  ;;  %v627_v57 = vmul.f32 %v2108_v49, %v542_v62 }
 0x166   : > { %v951_v20 = vadd.f32 %v2151_v10, %v845_v16 }
 0x167   : > { %v952_v22 = vadd.f32 %v2153_v12, %v847_v37  ;;  %v850_v23 = vpop.f32.mrb[50].mxu0  ;;  %1249 = vmatprep.mubr.f32.mxu1 %v1014_v17 }
 0x168   : > { %v851_v53 = vadd.f32 %v850_v23, %v620_v18  ;;  %v852_v24 = vpop.f32.mrb[51].mxu0  ;;  %1250 = vmatmul.mubr.f32.gmra.mrb[38].mxu1 %v1013_v19  ;;  %v1015_v54 = vmax.f32 %v951_v20, 0.0  ;;  %v547_v36 = vpop.permute.xlu1 %546 }
 0x169   : > { %v1016_v25 = vmax.f32 %v952_v22, 0.0  ;;  %v853_v26 = vadd.f32 %v852_v24, %v621_v21  ;;  %v628_v1 = vmul.f32 %v2106_v48, %v547_v36  ;;  %v629_v6 = vmul.f32 %v2108_v49, %v547_v36 }
 0x16a   : > { %v953_v63 = vadd.f32 %v2151_v10, %v851_v53 }
 0x16b   : > { %v954_v27 = vadd.f32 %v2153_v12, %v853_v26  ;;  %v856_v28 = vpop.f32.mrb[52].mxu0  ;;  %1254 = vmatprep.mubr.f32.mxu1 %v1016_v25 }
 0x16c   : > { %v857_v29 = vadd.f32 %v856_v28, %v2141_v2  ;;  %v858_v35 = vpop.f32.mrb[53].mxu0  ;;  %1255 = vmatmul.mubr.f32.gmra.mrb[40].mxu1 %v1015_v54  ;;  %v1017_v0 = vmax.f32 %v953_v63, 0.0  ;;  %v552_v55 = vpop.permute.xlu1 %551 }
 0x16d   : > { %v1018_v30 = vmax.f32 %v954_v27, 0.0  ;;  %v859_v31 = vadd.f32 %v858_v35, %v2144_v3  ;;  %v630_v13 = vmul.f32 %v2106_v48, %v552_v55  ;;  %v631_v43 = vmul.f32 %v2108_v49, %v552_v55 }
 0x16e   : > { %v955_v32 = vadd.f32 %v2151_v10, %v857_v29  ;;  %v2299_v29 = vld [vmem:[%s2425_s6] ss:$0 sm:$0xff] }
 0x16f   : > { %v956_v38 = vadd.f32 %v2153_v12, %v859_v31  ;;  %v862_v40 = vpop.f32.mrb[54].mxu0  ;;  %1259 = vmatprep.mubr.f32.mxu1 %v1018_v30 }
 0x170   : > { %v863_v39 = vadd.f32 %v862_v40, %v624_v47  ;;  %v864_v41 = vpop.f32.mrb[55].mxu0  ;;  %1260 = vmatmul.mubr.f32.gmra.mrb[42].mxu1 %v1017_v0  ;;  %v1019_v3 = vmax.f32 %v955_v32, 0.0  ;;  %v557_v15 = vpop.permute.xlu1 %556 }
 0x171   : > { %v1020_v2 = vmax.f32 %v956_v38, 0.0  ;;  %v865_v56 = vadd.f32 %v864_v41, %v625_v34  ;;  %v632_v20 = vmul.f32 %v2106_v48, %v557_v15  ;;  %v633_v23 = vmul.f32 %v2108_v49, %v557_v15 }
 0x172   : > { %v957_v44 = vadd.f32 %v2151_v10, %v863_v39 }
 0x173   : > { %v958_v45 = vadd.f32 %v2153_v12, %v865_v56  ;;  %v868_v46 = vpop.f32.mrb[56].mxu0  ;;  %1264 = vmatprep.mubr.f32.mxu1 %v1020_v2 }
 0x174   : > { %v869_v50 = vadd.f32 %v868_v46, %v626_v42  ;;  %v870_v52 = vpop.f32.mrb[57].mxu0  ;;  %1265 = vmatmul.mubr.f32.gmra.mrb[44].mxu1 %v1019_v3  ;;  %v1021_v4 = vmax.f32 %v957_v44, 0.0 }
 0x175   : > { %v1022_v58 = vmax.f32 %v958_v45, 0.0  ;;  %v871_v61 = vadd.f32 %v870_v52, %v627_v57 }
 0x176   : > { %v959_v5 = vadd.f32 %v2151_v10, %v869_v50 }
 0x177   : > { %v960_v7 = vadd.f32 %v2153_v12, %v871_v61  ;;  %v874_v8 = vpop.f32.mrb[58].mxu0  ;;  %1269 = vmatprep.mubr.f32.mxu1 %v1022_v58 }
 0x178   : > { %v875_v9 = vadd.f32 %v874_v8, %v628_v1  ;;  %v876_v11 = vpop.f32.mrb[59].mxu0  ;;  %1270 = vmatmul.mubr.f32.gmra.mrb[46].mxu1 %v1021_v4  ;;  %v1023_v14 = vmax.f32 %v959_v5, 0.0 }
 0x179   : > { %v1024_v59 = vmax.f32 %v960_v7, 0.0  ;;  %v877_v51 = vadd.f32 %v876_v11, %v629_v6 }
 0x17a   : > { %v961_v60 = vadd.f32 %v2151_v10, %v875_v9 }
 0x17b   : > { %v962_v16 = vadd.f32 %v2153_v12, %v877_v51  ;;  %v880_v33 = vpop.f32.mrb[60].mxu0  ;;  %1274 = vmatprep.mubr.f32.mxu1 %v1024_v59 }
 0x17c   : > { %v881_v17 = vadd.f32 %v880_v33, %v630_v13  ;;  %v882_v37 = vpop.f32.mrb[61].mxu0  ;;  %1275 = vmatmul.mubr.f32.gmra.mrb[48].mxu1 %v1023_v14  ;;  %v1025_v21 = vmax.f32 %v961_v60, 0.0 }
 0x17d   : > { %v1026_v18 = vmax.f32 %v962_v16, 0.0  ;;  %v883_v19 = vadd.f32 %v882_v37, %v631_v43 }
 0x17e   : > { %v963_v22 = vadd.f32 %v2151_v10, %v881_v17 }
 0x17f   : > { %v964_v53 = vadd.f32 %v2153_v12, %v883_v19  ;;  %v886_v24 = vpop.f32.mrb[62].mxu0  ;;  %1279 = vmatprep.mubr.f32.mxu1 %v1026_v18 }
 0x180   : > { %v887_v62 = vadd.f32 %v886_v24, %v632_v20  ;;  %v888_v25 = vpop.f32.mrb[63].mxu0  ;;  %1280 = vmatmul.mubr.f32.gmra.mrb[50].mxu1 %v1025_v21  ;;  %v1027_v63 = vmax.f32 %v963_v22, 0.0 }
 0x181   : > { %v1028_v26 = vmax.f32 %v964_v53, 0.0  ;;  %v889_v54 = vadd.f32 %v888_v25, %v633_v23 }
 0x182   : > { %v965_v27 = vadd.f32 %v2151_v10, %v887_v62 }
 0x183   : > { %v966_v48 = vadd.f32 %v2153_v12, %v889_v54  ;;  %1284 = vmatprep.mubr.f32.mxu1 %v1028_v26 }
 0x184   : > { %1285 = vmatmul.mubr.f32.gmra.mrb[52].mxu1 %v1027_v63  ;;  %v1029_v49 = vmax.f32 %v965_v27, 0.0 }
 0x185   : > { %v1030_v28 = vmax.f32 %v966_v48, 0.0 }
 0x187   : > { %1289 = vmatprep.mubr.f32.mxu1 %v1030_v28 }
 0x188   : > { %1290 = vmatmul.mubr.f32.gmra.mrb[54].mxu1 %v1029_v49 }
 0x1df   : > { %v1136_v35 = vpop.f32.mrb[64].mxu0 }
 0x1e0   : > { %v1137_v30 = vadd.f32 %v2299_v29, %v1136_v35  ;;  %v1138_v10 = vpop.f32.mrb[65].mxu0 }
 0x1e2   : > { %1295 = vst [vmem:[%s2302_s22] sm:$0xff] %v1137_v30 }
 0x1e3   : > { %v1141_v12 = vpop.f32.mrb[66].mxu0 }
 0x1e4   : > { %v1142_v31 = vadd.f32 %v2299_v29, %v1141_v12  ;;  %v1143_v47 = vpop.f32.mrb[67].mxu0 }
 0x1e6   : > { %1296 = vst [vmem:[%s2302_s22 + $0x8] sm:$0xff] %v1142_v31 }
 0x1e7   : > { %v1146_v0 = vpop.f32.mrb[68].mxu0 }
 0x1e8   : > { %v1147_v32 = vadd.f32 %v2299_v29, %v1146_v0  ;;  %v1148_v34 = vpop.f32.mrb[69].mxu0 }
 0x1ea   : > { %1297 = vst [vmem:[%s2302_s22 + $0x10] sm:$0xff] %v1147_v32 }
 0x1eb   : > { %v1151_v36 = vpop.f32.mrb[70].mxu0 }
 0x1ec   : > { %v1152_v38 = vadd.f32 %v2299_v29, %v1151_v36  ;;  %v1153_v40 = vpop.f32.mrb[71].mxu0 }
 0x1ee   : > { %1298 = vst [vmem:[%s2302_s22 + $0x18] sm:$0xff] %v1152_v38 }
 0x1ef   : > { %v1156_v39 = vpop.f32.mrb[0].mxu1 }
 0x1f0   : > { %v1157_v41 = vadd.f32 %v2299_v29, %v1156_v39  ;;  %v1158_v2 = vpop.f32.mrb[1].mxu1 }
 0x1f2   : > { %1299 = vst [vmem:[%s2302_s22 + $0x20] sm:$0xff] %v1157_v41 }
 0x1f3   : > { %v1161_v56 = vpop.f32.mrb[2].mxu1 }
 0x1f4   : > { %v1162_v42 = vadd.f32 %v2299_v29, %v1161_v56  ;;  %v1163_v3 = vpop.f32.mrb[3].mxu1 }
 0x1f6   : > { %1300 = vst [vmem:[%s2302_s22 + $0x28] sm:$0xff] %v1162_v42 }
 0x1f7   : > { %v1166_v44 = vpop.f32.mrb[4].mxu1 }
 0x1f8   : > { %v1167_v57 = vadd.f32 %v2299_v29, %v1166_v44  ;;  %v1168_v45 = vpop.f32.mrb[5].mxu1 }
 0x1fa   : > { %1301 = vst [vmem:[%s2302_s22 + $0x30] sm:$0xff] %v1167_v57 }
 0x1fb   : > { %v1171_v46 = vpop.f32.mrb[6].mxu1 }
 0x1fc   : > { %v1172_v50 = vadd.f32 %v2299_v29, %v1171_v46  ;;  %v1173_v52 = vpop.f32.mrb[7].mxu1 }
 0x1fe   : > { %1302 = vst [vmem:[%s2302_s22 + $0x38] sm:$0xff] %v1172_v50 }
 0x1ff   : > { %v1176_v55 = vpop.f32.mrb[8].mxu1 }
 0x200   : > { %v1177_v58 = vadd.f32 %v2299_v29, %v1176_v55  ;;  %v1178_v61 = vpop.f32.mrb[9].mxu1 }
 0x202   : > { %1303 = vst [vmem:[%s2302_s22 + $0x40] sm:$0xff] %v1177_v58 }
 0x203   : > { %v1181_v1 = vpop.f32.mrb[10].mxu1 }
 0x204   : > { %v1182_v4 = vadd.f32 %v2299_v29, %v1181_v1  ;;  %v1183_v5 = vpop.f32.mrb[11].mxu1 }
 0x206   : > { %1304 = vst [vmem:[%s2302_s22 + $0x48] sm:$0xff] %v1182_v4 }
 0x207   : > { %v1186_v6 = vpop.f32.mrb[12].mxu1 }
 0x208   : > { %v1187_v7 = vadd.f32 %v2299_v29, %v1186_v6  ;;  %v1188_v8 = vpop.f32.mrb[13].mxu1 }
 0x20a   : > { %1305 = vst [vmem:[%s2302_s22 + $0x50] sm:$0xff] %v1187_v7 }
 0x20b   : > { %v1191_v9 = vpop.f32.mrb[14].mxu1 }
 0x20c   : > { %v1192_v11 = vadd.f32 %v2299_v29, %v1191_v9  ;;  %v1193_v59 = vpop.f32.mrb[15].mxu1 }
 0x20e   : > { %1306 = vst [vmem:[%s2302_s22 + $0x58] sm:$0xff] %v1192_v11 }
 0x20f   : > { %v1196_v51 = vpop.f32.mrb[16].mxu1 }
 0x210   : > { %v1197_v13 = vadd.f32 %v2299_v29, %v1196_v51  ;;  %v1198_v14 = vpop.f32.mrb[17].mxu1 }
 0x212   : > { %1307 = vst [vmem:[%s2302_s22 + $0x60] sm:$0xff] %v1197_v13 }
 0x213   : > { %v1201_v60 = vpop.f32.mrb[18].mxu1 }
 0x214   : > { %v1202_v43 = vadd.f32 %v2299_v29, %v1201_v60  ;;  %v1203_v15 = vpop.f32.mrb[19].mxu1 }
 0x216   : > { %1308 = vst [vmem:[%s2302_s22 + $0x68] sm:$0xff] %v1202_v43 }
 0x217   : > { %v1206_v16 = vpop.f32.mrb[20].mxu1 }
 0x218   : > { %v1207_v33 = vadd.f32 %v2299_v29, %v1206_v16  ;;  %v1208_v17 = vpop.f32.mrb[21].mxu1 }
 0x21a   : > { %1309 = vst [vmem:[%s2302_s22 + $0x70] sm:$0xff] %v1207_v33 }
 0x21b   : > { %v1211_v37 = vpop.f32.mrb[22].mxu1 }
 0x21c   : > { %v1212_v18 = vadd.f32 %v2299_v29, %v1211_v37  ;;  %v1213_v19 = vpop.f32.mrb[23].mxu1 }
 0x21e   : > { %1310 = vst [vmem:[%s2302_s22 + $0x78] sm:$0xff] %v1212_v18 }
 0x21f   : > { %v1216_v20 = vpop.f32.mrb[24].mxu1 }
 0x220   : > { %v1217_v21 = vadd.f32 %v2299_v29, %v1216_v20  ;;  %v1218_v22 = vpop.f32.mrb[25].mxu1 }
 0x222   : > { %1311 = vst [vmem:[%s2302_s22 + $0x80] sm:$0xff] %v1217_v21 }
 0x223   : > { %v1221_v23 = vpop.f32.mrb[26].mxu1 }
 0x224   : > { %v1222_v53 = vadd.f32 %v2299_v29, %v1221_v23  ;;  %v1223_v24 = vpop.f32.mrb[27].mxu1 }
 0x226   : > { %1312 = vst [vmem:[%s2302_s22 + $0x88] sm:$0xff] %v1222_v53 }
 0x227   : > { %v1226_v62 = vpop.f32.mrb[28].mxu1 }
 0x228   : > { %v1227_v25 = vadd.f32 %v2299_v29, %v1226_v62  ;;  %v1228_v26 = vpop.f32.mrb[29].mxu1 }
 0x22a   : > { %1313 = vst [vmem:[%s2302_s22 + $0x90] sm:$0xff] %v1227_v25 }
 0x22b   : > { %v1231_v54 = vpop.f32.mrb[30].mxu1 }
 0x22c   : > { %v1232_v63 = vadd.f32 %v2299_v29, %v1231_v54  ;;  %v1233_v27 = vpop.f32.mrb[31].mxu1 }
 0x22e   : > { %1314 = vst [vmem:[%s2302_s22 + $0x98] sm:$0xff] %v1232_v63 }
 0x22f   : > { %v1236_v48 = vpop.f32.mrb[32].mxu1 }
 0x230   : > { %v1237_v28 = vadd.f32 %v2299_v29, %v1236_v48  ;;  %v1238_v49 = vpop.f32.mrb[33].mxu1 }
 0x232   : > { %1315 = vst [vmem:[%s2302_s22 + $0xa0] sm:$0xff] %v1237_v28 }
 0x233   : > { %v1241_v35 = vpop.f32.mrb[34].mxu1 }
 0x234   : > { %v1242_v30 = vadd.f32 %v2299_v29, %v1241_v35  ;;  %v1243_v10 = vpop.f32.mrb[35].mxu1 }
 0x236   : > { %1316 = vst [vmem:[%s2302_s22 + $0xa8] sm:$0xff] %v1242_v30 }
 0x237   : > { %v1246_v12 = vpop.f32.mrb[36].mxu1 }
 0x238   : > { %v1247_v31 = vadd.f32 %v2299_v29, %v1246_v12  ;;  %v1248_v47 = vpop.f32.mrb[37].mxu1 }
 0x23a   : > { %1317 = vst [vmem:[%s2302_s22 + $0xb0] sm:$0xff] %v1247_v31 }
 0x23b   : > { %v1251_v0 = vpop.f32.mrb[38].mxu1 }
 0x23c   : > { %v1252_v32 = vadd.f32 %v2299_v29, %v1251_v0  ;;  %v1253_v34 = vpop.f32.mrb[39].mxu1 }
 0x23e   : > { %1318 = vst [vmem:[%s2302_s22 + $0xb8] sm:$0xff] %v1252_v32 }
 0x23f   : > { %v1256_v36 = vpop.f32.mrb[40].mxu1 }
 0x240   : > { %v1257_v38 = vadd.f32 %v2299_v29, %v1256_v36  ;;  %v1258_v40 = vpop.f32.mrb[41].mxu1 }
 0x242   : > { %1319 = vst [vmem:[%s2302_s22 + $0xc0] sm:$0xff] %v1257_v38 }
 0x243   : > { %v1261_v39 = vpop.f32.mrb[42].mxu1 }
 0x244   : > { %v1262_v41 = vadd.f32 %v2299_v29, %v1261_v39  ;;  %v1263_v2 = vpop.f32.mrb[43].mxu1 }
 0x246   : > { %1320 = vst [vmem:[%s2302_s22 + $0xc8] sm:$0xff] %v1262_v41 }
 0x247   : > { %v1266_v56 = vpop.f32.mrb[44].mxu1 }
 0x248   : > { %v1267_v42 = vadd.f32 %v2299_v29, %v1266_v56  ;;  %v1268_v3 = vpop.f32.mrb[45].mxu1 }
 0x24a   : > { %1321 = vst [vmem:[%s2302_s22 + $0xd0] sm:$0xff] %v1267_v42 }
 0x24b   : > { %v1271_v44 = vpop.f32.mrb[46].mxu1 }
 0x24c   : > { %v1272_v57 = vadd.f32 %v2299_v29, %v1271_v44  ;;  %v1273_v45 = vpop.f32.mrb[47].mxu1 }
 0x24e   : > { %1322 = vst [vmem:[%s2302_s22 + $0xd8] sm:$0xff] %v1272_v57 }
 0x24f   : > { %v1276_v46 = vpop.f32.mrb[48].mxu1 }
 0x250   : > { %v1277_v50 = vadd.f32 %v2299_v29, %v1276_v46  ;;  %v1278_v52 = vpop.f32.mrb[49].mxu1 }
 0x252   : > { %1323 = vst [vmem:[%s2302_s22 + $0xe0] sm:$0xff] %v1277_v50 }
 0x253   : > { %v1281_v55 = vpop.f32.mrb[50].mxu1 }
 0x254   : > { %v1282_v58 = vadd.f32 %v2299_v29, %v1281_v55  ;;  %v1283_v61 = vpop.f32.mrb[51].mxu1 }
 0x256   : > { %1324 = vst [vmem:[%s2302_s22 + $0xe8] sm:$0xff] %v1282_v58 }
 0x257   : > { %v1286_v1 = vpop.f32.mrb[52].mxu1 }
 0x258   : > { %v1287_v4 = vadd.f32 %v2299_v29, %v1286_v1  ;;  %v1288_v5 = vpop.f32.mrb[53].mxu1 }
 0x25a   : > { %1325 = vst [vmem:[%s2302_s22 + $0xf0] sm:$0xff] %v1287_v4 }
 0x25b   : > { %v1291_v6 = vpop.f32.mrb[54].mxu1 }
 0x25c   : > { %v1292_v7 = vadd.f32 %v2299_v29, %v1291_v6  ;;  %v1293_v8 = vpop.f32.mrb[55].mxu1 }
 0x25e   : > { %1326 = vst [vmem:[%s2302_s22 + $0xf8] sm:$0xff] %v1292_v7 }
 0x25f   : > { %1602 = shalt.err (!%p1599_p3)
}
 0x260   : > { %s1603_s17 = scalar_lea.hbm %s2370_s19, 4096  ;;  %s1607_s20 = scalar_lea.hbm %s2426_s7, 8192 }
 0x261   : > { %p1604_p4 = scmp.ne.s32.totalorder %s2370_s19, %s1603_s17  ;;  %p1608_p9 = scmp.lt.u32.totalorder %s2370_s19, %s2426_s7 }
 0x262   : > { %p1609_p10 = scmp.lt.u32.totalorder %s1607_s20, %s1603_s17  ;;  %p1611_p12 = scmp.lt.u32.totalorder %s1603_s17, %s2370_s19 }
 0x263   : > { %p1605_p7 = pnand %p1604_p4, %p1737_p5 }
 0x264   : > { %p1610_p11 = por %p1609_p10, %p1608_p9 }
 0x265   : > { %p1606_p8 = pneg %p1605_p7 }
 0x266   : > { %p1612_p13 = por %p1611_p12, %p1610_p11 }
 0x268   : > { %p1613_p0 = pnand %p1612_p13, %p1606_p8 }
 0x26a   : > { %1616 = shalt.err (!%p1613_p0)
}
 0x26b   : > { %s1657_s13 = smov 128   ;;  %s1658_s14 = smov 8  }
 0x26c   : > { %1543 = dma.vmem_to_hbm [thread:$0]  (%p1737_p5), %s2372_s29, 4096, %s2370_s19, %s2378_s16, %s1657_s13, %s1657_s13, %s1658_s14  }
 0x26d PF: > { %p1549_p1 = scmp.ge.s32.totalorder %s1651_s27, 2  ;;  %s1356_s28 = sand.u32 1, %s1639_s24  }
 0x26e   : > { %s1357_s15 = scalar_lea.sflag [#allocation3], %s1356_s28 }
 0x26f   : > { %p1546_p2 = pnand %p1549_p1, %p1741_p6 }
 0x271   : > { %1634 = dma.done.wait (!%p1546_p2), %s1357_s15, 4096  }
 0x272   : > { %1636 = vsyncadd (!%p1546_p2), %s1357_s15, 4294963200  ;;  %p17_p3 = scmp.ge.s32.totalorder %s1724_s30, 4   ;;  %s2430_s24 = smov %s1643_s25 }
 0x273   : > { %s2431_s25 = smov %s1647_s26  ;;  %s2432_s26 = smov %s1735_s10 }
 0x274   : > { %s2433_s27 = smov %s1724_s30  ;;  %19 = sbr.rel (!%p17_p3) target bundleno = 3 (0x3), region = 86 }
 0x27b   :  { %1362 = vsyncpa [#allocation3], 1 }
 0x27c   :  { %1364 = vsyncpa [#allocation3 + $0x1], 1 }

</bundles_post_ra>
